<compile_context>
chip_gen: v7x
topology: tpu7x:2x2x1
jax: 0.10.0
libtpu: 0.0.40
codegen_flags: <defaults>
</compile_context>

<pallas_src>
import jax
import jax.numpy as jnp
from jax.experimental import pallas as pl
from jax.experimental.pallas import tpu as pltpu

# Fixed hidden sizes from the module definition, and their 128-aligned padded widths.
HIDDEN = (400, 212, 100, 25)
HIDDEN_PAD = (512, 256, 128, 128)
BN_EPS = 1e-5


def _mlp_kernel(x_ref,
                w1, b1, w2, b2, w3, b3, w4, b4, w5, b5,
                out_ref):
    """One batch tile of the full forward pass, batch kept on the lane axis.

    x_ref : (input_size, TB) bf16  -- streamed per grid step
    w_i   : (out_pad, in_pad) bf16 -- BN folded in, transposed, zero-padded to 128 multiples
    b_i   : (out_pad, 1)     f32
    w5    : (128, 1) f32 head column (first 25 rows real), b5: (1, 1) f32
    out   : (1, TB) f32 probabilities -- lane-dense row store
    """
    h = x_ref[...]                                          # bf16 activations, batch on lanes
    for w, b in ((w1, b1), (w2, b2), (w3, b3), (w4, b4)):
        # Linear(+folded BN) on the MXU with f32 accumulation, bias + ReLU in f32.
        z = jnp.dot(w[...], h, preferred_element_type=jnp.float32) + b[...]
        h = jnp.maximum(z, 0.0).astype(jnp.bfloat16)        # ReLU; Dropout = identity at eval
    # 1-wide head: VPU multiply + sublane reduce gives the logits already lane-major (1, TB).
    logits = jnp.sum(h.astype(jnp.float32) * w5[...], axis=0, keepdims=True) + b5[...]
    # Numerically stable sigmoid (no inf intermediates); only TB transcendentals per tile.
    ez = jnp.exp(-jnp.abs(logits))
    out_ref[...] = jnp.where(logits >= 0.0, 1.0, ez) / (1.0 + ez)


def spaceship_nn_forward(x, params, *, block_batch=512):
    """SpaceshipNN eval-mode forward.

    x:       (B, input_size) float32
    params:  dict of Linear weights/biases + BatchNorm gamma/beta/mean/var (float32).
    returns: (B, 1) float32 probabilities.
    """
    B, input_size = x.shape

    # --- fold BatchNorm1d (eval) into the Linear layers; transpose & zero-pad to 128 -----
    in_dims = (input_size,) + HIDDEN          # per-layer real input widths
    in_pads = (input_size,) + HIDDEN_PAD      # per-layer padded input widths
    weights, biases = [], []
    for i in range(4):
        w = params[f"w{i + 1}"]                             # (in, out) = torch W.T
        b = params[f"b{i + 1}"]                             # (out,)
        scale = params[f"gamma{i + 1}"] * jax.lax.rsqrt(params[f"var{i + 1}"] + BN_EPS)
        shift = params[f"beta{i + 1}"] - params[f"mean{i + 1}"] * scale
        w_fold_t = (w * scale[None, :]).T                   # (out, in), BN folded, transposed
        b_fold = b * scale + shift                          # (out,)
        out_pad, in_pad = HIDDEN_PAD[i], in_pads[i]
        wt = jnp.zeros((out_pad, in_pad), jnp.float32)
        wt = wt.at[:HIDDEN[i], :in_dims[i]].set(w_fold_t)
        bt = jnp.zeros((out_pad, 1), jnp.float32).at[:HIDDEN[i], 0].set(b_fold)
        weights.append(wt.astype(jnp.bfloat16))
        biases.append(bt)

    # Head: (25,1) column zero-padded to 128 rows; used on the VPU so kept in f32.
    w5 = jnp.zeros((HIDDEN_PAD[-1], 1), jnp.float32).at[:HIDDEN[-1], :].set(params["w5"])
    b5 = params["b5"].reshape(1, 1).astype(jnp.float32)
    weights.append(w5)
    biases.append(b5)

    # --- batch tiling: batch on the lane axis ---------------------------------------------
    TB = block_batch
    B_pad = pl.cdiv(B, TB) * TB
    x_t = x.astype(jnp.bfloat16).T                          # (input_size, B), bf16 stream
    if B_pad != B:
        x_t = jnp.pad(x_t, ((0, 0), (0, B_pad - B)))
    grid = (B_pad // TB,)

    def resident(arr):
        # VMEM-resident parameter: constant block index, single-buffered (no dead 2nd buffer).
        return pl.BlockSpec(arr.shape, lambda i: (0, 0),
                            pipeline_mode=pl.Buffered(buffer_count=1))

    in_specs = [pl.BlockSpec((input_size, TB), lambda i: (0, i))]
    args = [x_t]
    for w, b in zip(weights, biases):
        in_specs += [resident(w), resident(b)]
        args += [w, b]

    out = pl.pallas_call(
        _mlp_kernel,
        out_shape=jax.ShapeDtypeStruct((1, B_pad), jnp.float32),
        grid=grid,
        in_specs=in_specs,
        out_specs=pl.BlockSpec((1, TB), lambda i: (0, i)),
        compiler_params=pltpu.CompilerParams(dimension_semantics=("parallel",)),
    )(*args)
    return out[0, :B][:, None]


def init_params(key, input_size):
    """Deterministic synthetic parameters (PyTorch-style uniform fan-in init)."""
    params = {}
    dims = (input_size,) + HIDDEN + (1,)
    keys = jax.random.split(key, 5 * 2 + 4 * 4)
    k = iter(keys)
    for i in range(5):
        fan_in, fan_out = dims[i], dims[i + 1]
        bound = 1.0 / jnp.sqrt(jnp.float32(fan_in))
        params[f"w{i + 1}"] = jax.random.uniform(
            next(k), (fan_in, fan_out), jnp.float32, -bound, bound)
        params[f"b{i + 1}"] = jax.random.uniform(
            next(k), (fan_out,), jnp.float32, -bound, bound)
    for i in range(4):
        n = HIDDEN[i]
        params[f"gamma{i + 1}"] = jax.random.uniform(next(k), (n,), jnp.float32, 0.5, 1.5)
        params[f"beta{i + 1}"] = 0.1 * jax.random.normal(next(k), (n,), jnp.float32)
        params[f"mean{i + 1}"] = 0.1 * jax.random.normal(next(k), (n,), jnp.float32)
        params[f"var{i + 1}"] = jax.random.uniform(next(k), (n,), jnp.float32, 0.5, 1.5)
    return params


def reference_forward(x, params):
    """Pure-JAX f32 reference of the same eval-mode forward pass (PyTorch semantics)."""
    h = x
    for i in range(4):
        z = h @ params[f"w{i + 1}"] + params[f"b{i + 1}"]
        z = (z - params[f"mean{i + 1}"]) / jnp.sqrt(params[f"var{i + 1}"] + BN_EPS)
        z = z * params[f"gamma{i + 1}"] + params[f"beta{i + 1}"]
        h = jnp.maximum(z, 0.0)
    logits = h @ params["w5"] + params["b5"]
    return jax.nn.sigmoid(logits)


if __name__ == "__main__":
    key = jax.random.PRNGKey(0)
    k_params, k_x = jax.random.split(key)

    batch = 256                 # small demo batch
    input_size = 32             # synthetic tabular feature count

    params = init_params(k_params, input_size)
    x = jax.random.normal(k_x, (batch, input_size), jnp.float32)

    # block_batch=128 -> grid of 2 even batch tiles (keeps both v7x TensorCores busy).
    # For large real batches, leave the default block_batch=512.
    out = spaceship_nn_forward(x, params, block_batch=128)
    out = jax.block_until_ready(out)

    ref = reference_forward(x, params)
    assert out.shape == (batch, 1)
    assert bool(jnp.all(jnp.isfinite(out)))
    # bf16 inputs/weights change results at the ~1e-3..1e-2 level vs the f32 reference.
    assert float(jnp.max(jnp.abs(out - ref))) < 3e-2, "mismatch vs pure-JAX reference"

    print("KERNEL_OK")
</pallas_src>

<mosaic_0001>
module attributes {stable_mosaic.version = 11 : i64} {
  func.func @_mlp_kernel(%arg0: i32, %arg1: memref<32x128xbf16, #tpu.memory_space<vmem>>, %arg2: memref<512x32xbf16, #tpu.memory_space<vmem>>, %arg3: memref<512x1xf32, #tpu.memory_space<vmem>>, %arg4: memref<256x512xbf16, #tpu.memory_space<vmem>>, %arg5: memref<256x1xf32, #tpu.memory_space<vmem>>, %arg6: memref<128x256xbf16, #tpu.memory_space<vmem>>, %arg7: memref<128x1xf32, #tpu.memory_space<vmem>>, %arg8: memref<128x128xbf16, #tpu.memory_space<vmem>>, %arg9: memref<128x1xf32, #tpu.memory_space<vmem>>, %arg10: memref<128x1xf32, #tpu.memory_space<vmem>>, %arg11: memref<1x1xf32, #tpu.memory_space<vmem>>, %arg12: memref<1x128xf32, #tpu.memory_space<vmem>>) attributes {dimension_semantics = [#tpu.dimension_semantics<parallel>], iteration_bounds = array<i64: 2>, scalar_prefetch = 0 : i64, scratch_operands = 0 : i64, tpu.core_type = #tpu.core_type<tc>, window_params = [{transform_indices = @transform_0, window_bounds = array<i64: 32, 128>}, {pipeline_mode = #tpu.pipeline_mode<synchronous>, transform_indices = @transform_1, window_bounds = array<i64: 512, 32>}, {pipeline_mode = #tpu.pipeline_mode<synchronous>, transform_indices = @transform_2, window_bounds = array<i64: 512, 1>}, {pipeline_mode = #tpu.pipeline_mode<synchronous>, transform_indices = @transform_3, window_bounds = array<i64: 256, 512>}, {pipeline_mode = #tpu.pipeline_mode<synchronous>, transform_indices = @transform_4, window_bounds = array<i64: 256, 1>}, {pipeline_mode = #tpu.pipeline_mode<synchronous>, transform_indices = @transform_5, window_bounds = array<i64: 128, 256>}, {pipeline_mode = #tpu.pipeline_mode<synchronous>, transform_indices = @transform_6, window_bounds = array<i64: 128, 1>}, {pipeline_mode = #tpu.pipeline_mode<synchronous>, transform_indices = @transform_7, window_bounds = array<i64: 128, 128>}, {pipeline_mode = #tpu.pipeline_mode<synchronous>, transform_indices = @transform_8, window_bounds = array<i64: 128, 1>}, {pipeline_mode = #tpu.pipeline_mode<synchronous>, transform_indices = @transform_9, window_bounds = array<i64: 128, 1>}, {pipeline_mode = #tpu.pipeline_mode<synchronous>, transform_indices = @transform_10, window_bounds = array<i64: 1, 1>}, {transform_indices = @transform_11, window_bounds = array<i64: 1, 128>}]} {
    %c0 = arith.constant 0 : index
    %c0_0 = arith.constant 0 : index
    %0 = vector.load %arg1[%c0, %c0_0] : memref<32x128xbf16, #tpu.memory_space<vmem>>, vector<32x128xbf16>
    %c0_1 = arith.constant 0 : index
    %c0_2 = arith.constant 0 : index
    %1 = vector.load %arg2[%c0_1, %c0_2] : memref<512x32xbf16, #tpu.memory_space<vmem>>, vector<512x32xbf16>
    %cst = arith.constant dense<0.000000e+00> : vector<512x128xf32>
    %2 = tpu.matmul %1, %0, %cst {dimension_numbers = #tpu.dot_dimension_numbers<[1], [0], [0], [1], [0, 0, 1, 1], [], []>} : vector<512x32xbf16>, vector<32x128xbf16>, vector<512x128xf32> -> vector<512x128xf32>
    %c0_3 = arith.constant 0 : index
    %c0_4 = arith.constant 0 : index
    %3 = vector.load %arg3[%c0_3, %c0_4] : memref<512x1xf32, #tpu.memory_space<vmem>>, vector<512x1xf32>
    %4 = vector.broadcast %3 : vector<512x1xf32> to vector<512x128xf32>
    %5 = arith.addf %2, %4 : vector<512x128xf32>
    %cst_5 = arith.constant 0.000000e+00 : f32
    %6 = vector.broadcast %cst_5 : f32 to vector<512x128xf32>
    %7 = arith.maximumf %5, %6 : vector<512x128xf32>
    %8 = arith.truncf %7 : vector<512x128xf32> to vector<512x128xbf16>
    %c0_6 = arith.constant 0 : index
    %c0_7 = arith.constant 0 : index
    %9 = vector.load %arg4[%c0_6, %c0_7] : memref<256x512xbf16, #tpu.memory_space<vmem>>, vector<256x512xbf16>
    %cst_8 = arith.constant dense<0.000000e+00> : vector<256x128xf32>
    %10 = tpu.matmul %9, %8, %cst_8 {dimension_numbers = #tpu.dot_dimension_numbers<[1], [0], [0], [1], [0, 0, 1, 1], [], []>} : vector<256x512xbf16>, vector<512x128xbf16>, vector<256x128xf32> -> vector<256x128xf32>
    %c0_9 = arith.constant 0 : index
    %c0_10 = arith.constant 0 : index
    %11 = vector.load %arg5[%c0_9, %c0_10] : memref<256x1xf32, #tpu.memory_space<vmem>>, vector<256x1xf32>
    %12 = vector.broadcast %11 : vector<256x1xf32> to vector<256x128xf32>
    %13 = arith.addf %10, %12 : vector<256x128xf32>
    %cst_11 = arith.constant 0.000000e+00 : f32
    %14 = vector.broadcast %cst_11 : f32 to vector<256x128xf32>
    %15 = arith.maximumf %13, %14 : vector<256x128xf32>
    %16 = arith.truncf %15 : vector<256x128xf32> to vector<256x128xbf16>
    %c0_12 = arith.constant 0 : index
    %c0_13 = arith.constant 0 : index
    %17 = vector.load %arg6[%c0_12, %c0_13] : memref<128x256xbf16, #tpu.memory_space<vmem>>, vector<128x256xbf16>
    %cst_14 = arith.constant dense<0.000000e+00> : vector<128x128xf32>
    %18 = tpu.matmul %17, %16, %cst_14 {dimension_numbers = #tpu.dot_dimension_numbers<[1], [0], [0], [1], [0, 0, 1, 1], [], []>} : vector<128x256xbf16>, vector<256x128xbf16>, vector<128x128xf32> -> vector<128x128xf32>
    %c0_15 = arith.constant 0 : index
    %c0_16 = arith.constant 0 : index
    %19 = vector.load %arg7[%c0_15, %c0_16] : memref<128x1xf32, #tpu.memory_space<vmem>>, vector<128x1xf32>
    %20 = vector.broadcast %19 : vector<128x1xf32> to vector<128x128xf32>
    %21 = arith.addf %18, %20 : vector<128x128xf32>
    %cst_17 = arith.constant 0.000000e+00 : f32
    %22 = vector.broadcast %cst_17 : f32 to vector<128x128xf32>
    %23 = arith.maximumf %21, %22 : vector<128x128xf32>
    %24 = arith.truncf %23 : vector<128x128xf32> to vector<128x128xbf16>
    %c0_18 = arith.constant 0 : index
    %c0_19 = arith.constant 0 : index
    %25 = vector.load %arg8[%c0_18, %c0_19] : memref<128x128xbf16, #tpu.memory_space<vmem>>, vector<128x128xbf16>
    %cst_20 = arith.constant dense<0.000000e+00> : vector<128x128xf32>
    %26 = tpu.matmul %25, %24, %cst_20 {dimension_numbers = #tpu.dot_dimension_numbers<[1], [0], [0], [1], [0, 0, 1, 1], [], []>} : vector<128x128xbf16>, vector<128x128xbf16>, vector<128x128xf32> -> vector<128x128xf32>
    %c0_21 = arith.constant 0 : index
    %c0_22 = arith.constant 0 : index
    %27 = vector.load %arg9[%c0_21, %c0_22] : memref<128x1xf32, #tpu.memory_space<vmem>>, vector<128x1xf32>
    %28 = vector.broadcast %27 : vector<128x1xf32> to vector<128x128xf32>
    %29 = arith.addf %26, %28 : vector<128x128xf32>
    %cst_23 = arith.constant 0.000000e+00 : f32
    %30 = vector.broadcast %cst_23 : f32 to vector<128x128xf32>
    %31 = arith.maximumf %29, %30 : vector<128x128xf32>
    %32 = arith.truncf %31 : vector<128x128xf32> to vector<128x128xbf16>
    %33 = arith.extf %32 : vector<128x128xbf16> to vector<128x128xf32>
    %c0_24 = arith.constant 0 : index
    %c0_25 = arith.constant 0 : index
    %34 = vector.load %arg10[%c0_24, %c0_25] : memref<128x1xf32, #tpu.memory_space<vmem>>, vector<128x1xf32>
    %35 = vector.broadcast %34 : vector<128x1xf32> to vector<128x128xf32>
    %36 = arith.mulf %33, %35 : vector<128x128xf32>
    %cst_26 = arith.constant dense<0.000000e+00> : vector<128xf32>
    %37 = vector.multi_reduction <add>, %36, %cst_26 [0] : vector<128x128xf32> to vector<128xf32>
    %38 = vector.shape_cast %37 : vector<128xf32> to vector<1x128xf32>
    %c0_27 = arith.constant 0 : index
    %c0_28 = arith.constant 0 : index
    %39 = vector.load %arg11[%c0_27, %c0_28] : memref<1x1xf32, #tpu.memory_space<vmem>>, vector<1x1xf32>
    %40 = vector.broadcast %39 : vector<1x1xf32> to vector<1x128xf32>
    %41 = arith.addf %38, %40 : vector<1x128xf32>
    %42 = math.absf %41 : vector<1x128xf32>
    %cst_29 = arith.constant 0.000000e+00 : f32
    %43 = vector.broadcast %cst_29 : f32 to vector<1x128xf32>
    %44 = arith.subf %43, %42 : vector<1x128xf32>
    %45 = math.exp %44 : vector<1x128xf32>
    %cst_30 = arith.constant 0.000000e+00 : f32
    %46 = vector.broadcast %cst_30 : f32 to vector<1x128xf32>
    %47 = arith.cmpf oge, %41, %46 : vector<1x128xf32>
    %cst_31 = arith.constant 1.000000e+00 : f32
    %48 = vector.broadcast %cst_31 : f32 to vector<1x128xf32>
    %49 = arith.select %47, %48, %45 : vector<1x128xi1>, vector<1x128xf32>
    %cst_32 = arith.constant 1.000000e+00 : f32
    %50 = vector.broadcast %cst_32 : f32 to vector<1x128xf32>
    %51 = arith.addf %50, %45 : vector<1x128xf32>
    %52 = arith.divf %49, %51 : vector<1x128xf32>
    %c0_33 = arith.constant 0 : index
    %c0_34 = arith.constant 0 : index
    %53 = vector.load %arg12[%c0_33, %c0_34] : memref<1x128xf32, #tpu.memory_space<vmem>>, vector<1x128xf32>
    tpu.vector_store %arg12[%c0_33, %c0_34], %52 {strides = array<i32>} : memref<1x128xf32, #tpu.memory_space<vmem>>, vector<1x128xf32>,
    return
  }
  func.func @transform_0(%arg0: i32) -> (i32, i32) {
    %c0_i32 = arith.constant 0 : i32
    %c0_i32_0 = arith.constant 0 : i32
    return %c0_i32, %arg0 : i32, i32
  }
  func.func @transform_1(%arg0: i32) -> (i32, i32) {
    %c0_i32 = arith.constant 0 : i32
    %c0_i32_0 = arith.constant 0 : i32
    %c0_i32_1 = arith.constant 0 : i32
    return %c0_i32, %c0_i32_0 : i32, i32
  }
  func.func @transform_2(%arg0: i32) -> (i32, i32) {
    %c0_i32 = arith.constant 0 : i32
    %c0_i32_0 = arith.constant 0 : i32
    %c0_i32_1 = arith.constant 0 : i32
    return %c0_i32, %c0_i32_0 : i32, i32
  }
  func.func @transform_3(%arg0: i32) -> (i32, i32) {
    %c0_i32 = arith.constant 0 : i32
    %c0_i32_0 = arith.constant 0 : i32
    %c0_i32_1 = arith.constant 0 : i32
    return %c0_i32, %c0_i32_0 : i32, i32
  }
  func.func @transform_4(%arg0: i32) -> (i32, i32) {
    %c0_i32 = arith.constant 0 : i32
    %c0_i32_0 = arith.constant 0 : i32
    %c0_i32_1 = arith.constant 0 : i32
    return %c0_i32, %c0_i32_0 : i32, i32
  }
  func.func @transform_5(%arg0: i32) -> (i32, i32) {
    %c0_i32 = arith.constant 0 : i32
    %c0_i32_0 = arith.constant 0 : i32
    %c0_i32_1 = arith.constant 0 : i32
    return %c0_i32, %c0_i32_0 : i32, i32
  }
  func.func @transform_6(%arg0: i32) -> (i32, i32) {
    %c0_i32 = arith.constant 0 : i32
    %c0_i32_0 = arith.constant 0 : i32
    %c0_i32_1 = arith.constant 0 : i32
    return %c0_i32, %c0_i32_0 : i32, i32
  }
  func.func @transform_7(%arg0: i32) -> (i32, i32) {
    %c0_i32 = arith.constant 0 : i32
    %c0_i32_0 = arith.constant 0 : i32
    %c0_i32_1 = arith.constant 0 : i32
    return %c0_i32, %c0_i32_0 : i32, i32
  }
  func.func @transform_8(%arg0: i32) -> (i32, i32) {
    %c0_i32 = arith.constant 0 : i32
    %c0_i32_0 = arith.constant 0 : i32
    %c0_i32_1 = arith.constant 0 : i32
    return %c0_i32, %c0_i32_0 : i32, i32
  }
  func.func @transform_9(%arg0: i32) -> (i32, i32) {
    %c0_i32 = arith.constant 0 : i32
    %c0_i32_0 = arith.constant 0 : i32
    %c0_i32_1 = arith.constant 0 : i32
    return %c0_i32, %c0_i32_0 : i32, i32
  }
  func.func @transform_10(%arg0: i32) -> (i32, i32) {
    %c0_i32 = arith.constant 0 : i32
    %c0_i32_0 = arith.constant 0 : i32
    %c0_i32_1 = arith.constant 0 : i32
    return %c0_i32, %c0_i32_0 : i32, i32
  }
  func.func @transform_11(%arg0: i32) -> (i32, i32) {
    %c0_i32 = arith.constant 0 : i32
    %c0_i32_0 = arith.constant 0 : i32
    return %c0_i32, %arg0 : i32, i32
  }
}

</mosaic_0001>

<bundles_post_ra>
// kernel: tpu_custom_call.1
= control target key start
LH: loop header
LB: loop body
LE: loop exit
PB: predicated region body
PF: predicated region fallthrough
CT: control target
= control target key end

     0   :  { %s5623_s0 = inlined_call_operand.vmem [shape: bf16[32,256], index: 0, kind: input, shape index: {}]   ;;  %s5624_s1 = inlined_call_operand.vmem [shape: bf16[512,32], index: 1, kind: input, shape index: {}]   ;;  %s5625_s2 = inlined_call_operand.vmem [shape: f32[512,1], index: 2, kind: input, shape index: {}]   ;;  %s5626_s3 = inlined_call_operand.vmem [shape: bf16[256,512], index: 3, kind: input, shape index: {}]   ;;  %s5627_s4 = inlined_call_operand.vmem [shape: f32[256,1], index: 4, kind: input, shape index: {}]   ;;  %s5628_s5 = inlined_call_operand.vmem [shape: bf16[128,256], index: 5, kind: input, shape index: {}]   ;;  %s5629_s6 = inlined_call_operand.vmem [shape: f32[128,1], index: 6, kind: input, shape index: {}]   ;;  %s5630_s7 = inlined_call_operand.vmem [shape: bf16[128,128], index: 7, kind: input, shape index: {}]   ;;  %s5631_s8 = inlined_call_operand.vmem [shape: f32[128,1], index: 8, kind: input, shape index: {}]   ;;  %s5632_s9 = inlined_call_operand.vmem [shape: f32[128,1], index: 9, kind: input, shape index: {}]   ;;  %s5633_s10 = inlined_call_operand.<no memory space> [shape: f32[1,1], index: 10, kind: input, shape index: {}]   ;;  %s5634_s11 = inlined_call_operand.hbm [shape: f32[1,256], index: 11, kind: output, shape index: {}]  }
   0x1   :  { %v16_v0 = vstv %s5633_s10 }
   0x2   :  { %17 = vst [vmem:[#allocation2] sm:$0x1] %v16_v0 }
   0x3   :  { %18 = vsyncpa [#allocation5], 0 }
   0x4   :  { %20 = vsyncpa [#allocation5 + $0x1], 0  ;;  %s4269_s19 = smov 0   ;;  %s4271_s20 = smov 0  }
   0x5   :  { %s4273_s21 = smov 0   ;;  %s4275_s22 = smov 0  }
   0x6 LB: > { %s3329_s10 = sadd.s32 4294967295, %s4202_s22   ;;  %s3330_s23 = sadd.s32 4294967294, %s4202_s22   ;;  %s4202_s22 = sphi %s4275_s22, %s5648_s22   ;;  %s4198_s21 = sphi %s4273_s21, %s5647_s21   ;;  %s4194_s20 = sphi %s4271_s20, %s5646_s20   ;;  %s4190_s19 = sphi %s4269_s19, %s5645_s19  }
   0x7   : > { %s4292_s24 = sadd.s32 1, %s4202_s22   ;;  %s33_s25 = sadd.s32 1, %s4198_s21 }
   0x8   : > { %s30_s26 = ssub.s32 %s4202_s22, %s4292_s24  ;;  %p40_p0 = scmp.ne.s32.totalorder %s4198_s21, %s4194_s20 }
   0x9   : > { %p31_p1 = scmp.eq.s32.totalorder %s30_s26, 0  ;;  %p41_p2 = scmp.eq.s32.totalorder %s4202_s22, 0 }
   0xa   : > { %p280_p3 = scmp.eq.s32.totalorder %s3329_s10, 1  ;;  %p285_p4 = scmp.ne.s32.totalorder %s4194_s20, %s4190_s19 }
   0xb   : > { %s4305_s27 = scalar_select %p31_p1, %s4198_s21, %s33_s25  }
   0xc   : > { %p42_p5 = por %p41_p2, %p40_p0  ;;  %p4307_p6 = por %p280_p3, %p40_p0 }
   0xd   : > { %p286_p7 = scmp.eq.s32.totalorder %s3330_s23, 1  ;;  %p3332_p9 = scmp.ge.s32.totalorder %s4202_s22, 2 }
   0xf   : > { %p4311_p8 = por %p286_p7, %p285_p4  ;;  %332 = sbr.rel (%p3332_p9) target bundleno = 29 (0x1d), region = 56 }
  0x16   : > { %335 = sbr.rel (!%p42_p5) target bundleno = 29 (0x1d), region = 60  ;;  %s337_s30 = sand.u32 (%p42_p5), 1, %s4198_s21  }
  0x17   : > { %s3334_s12 = sshll.u32 (%p42_p5), %s4202_s22, 2  ;;  %s3333_s13 = sshll.u32 (%p42_p5), %s337_s30, 4 }
  0x18   : > { %s341_s16 = scalar_lea.vmem (%p42_p5), %s5623_s0, %s3334_s12  ;;  %s339_s17 = scalar_lea.vmem (%p42_p5), [#allocation3], %s3333_s13 }
  0x19   : > { %v357_v1 = vld [vmem:[%s341_s16] sm:$0xf] (%p42_p5)  ;;  %v359_v2 = vld [vmem:[%s341_s16 + $0x8] sm:$0xf] (%p42_p5)  ;;  %v361_v3 = vld [vmem:[%s341_s16 + $0x10] sm:$0xf] (%p42_p5) }
  0x1a   : > { %358 = vst [vmem:[%s339_s17] sm:$0xf] (%p42_p5), %v357_v1  ;;  %360 = vst [vmem:[%s339_s17 + $0x4] sm:$0xf] (%p42_p5), %v359_v2  ;;  %v363_v4 = vld [vmem:[%s341_s16 + $0x18] sm:$0xf] (%p42_p5) }
  0x1b   : > { %362 = vst [vmem:[%s339_s17 + $0x8] sm:$0xf] (%p42_p5), %v361_v3  ;;  %364 = vst [vmem:[%s339_s17 + $0xc] sm:$0xf] (%p42_p5), %v363_v4 }
  0x1d PF: > { %p3335_p10 = scmp.ge.s32.totalorder %s4202_s22, 1  ;;  %p394_p11 = scmp.lt.s32.totalorder %s4202_s22, 3 }
  0x1f   : > { %p395_p12 = pnand %p3335_p10, %p394_p11 }
  0x21   : > { %398 = sbr.rel (%p395_p12) target bundleno = 1348 (0x544), region = 101 }
  0x28   : > { %v524_v5 = vld [vmem:[%s5625_s2 + $0x80] sm:$0xff]  ;;  %s4332_s30 = sand.u32 1, %s4194_s20   ;;  %v4204_v7 = vmov 0   ;;  %v525_v8 = vld [vmem:[%s5625_s2 + $0x88] sm:$0xff]  ;;  %vm1064_vm0 = vcmask 261120   ;;  %v3978_v18 = vld [vmem:[%s5624_s1 + $0x10] sm:$0xff]  }
  0x29   : > { %v508_v6 = vld [vmem:[%s5625_s2] sm:$0xff]  ;;  %3973 = vset.pattern.permute.xlu1 %v4204_v7  ;;  %3972 = vset.pattern.permute.xlu0 %v4204_v7  ;;  %v509_v9 = vld [vmem:[%s5625_s2 + $0x8] sm:$0xff]  ;;  %s3336_s16 = sshll.u32 %s4332_s30, 4  ;;  %v526_v19 = vld [vmem:[%s5625_s2 + $0x90] sm:$0xff]  ;;  %s3491_s18 = sshll.u32 %s3329_s10, 4 }
  0x2a   : > { %654 = vperm.xlu0 %3972, %v524_v5   ;;  %574 = vperm.xlu1 %3973, %v508_v6   ;;  %v3976_v10 = vld [vmem:[%s5624_s1] sm:$0xff]   ;;  %s403_s23 = scalar_lea.vmem [#allocation3], %s3336_s16  ;;  %v557_v14 = vld [vmem:[%s5625_s2 + $0x188] sm:$0xff]  ;;  %v527_v20 = vld [vmem:[%s5625_s2 + $0x98] sm:$0xff]  ;;  %s5579_s13 = scalar_lea.hbm %s5634_s11, %s3491_s18 }
  0x2b   : > { %v3974_v11 = vld [vmem:[%s403_s23] sm:$0xff]   ;;  %v3975_v12 = vld [vmem:[%s403_s23 + $0x8] sm:$0xff]   ;;  %3836 = vmatprep.mubr.msk.bf16.mxu0 %vm1064_vm0, %v3976_v10  ;;  %s438_s23 = scalar_lea.vmem [#allocation4], %s4332_s30  ;;  %s3257_s14 = scalar_lea.sflag [#allocation5], %s4332_s30 }
  0x2c   : > { %3832 = vmatprep.subr.bf16.mxu0 %v3974_v11  ;;  %v556_v13 = vld [vmem:[%s5625_s2 + $0x180] sm:$0xff]  ;;  %v541_v16 = vld [vmem:[%s5625_s2 + $0x108] sm:$0xff]  ;;  %v510_v21 = vld [vmem:[%s5625_s2 + $0x10] sm:$0xff]  ;;  %s3269_s25 = sshll.u32 %s438_s23, 4  ;;  %s4205_s10 = smov [#allocation4]   ;;  %s5581_s25 = int_to_ptr.vmem [resolvable:$true] %s3269_s25 }
  0x2d   : > { %3833 = vmatpush3.bf16.msra.mxu0 %v3974_v11  ;;  %v540_v15 = vld [vmem:[%s5625_s2 + $0x100] sm:$0xff]  ;;  %v3977_v17 = vld [vmem:[%s5624_s1 + $0x8] sm:$0xff]   ;;  %v511_v22 = vld [vmem:[%s5625_s2 + $0x18] sm:$0xff]  ;;  %s4140_s15 = scalar_lea.vmem %s5581_s25, 16  ;;  %s4144_s16 = sshll.u32 %s4205_s10, 4  ;;  %s4145_s16 = int_to_ptr.vmem [resolvable:$false] %s4144_s16 }
  0x2e   : > { %659 = vperm.xlu0 %3972, %v525_v8   ;;  %579 = vperm.xlu1 %3973, %v509_v9   ;;  %v3979_v23 = vld [vmem:[%s5624_s1 + $0x18] sm:$0xff]   ;;  %v3980_v24 = vld [vmem:[%s5624_s1 + $0x20] sm:$0xff]   ;;  %v558_v25 = vld [vmem:[%s5625_s2 + $0x190] sm:$0xff]  ;;  %p4141_p13 = scmp.ne.s32.totalorder %s5581_s25, %s4140_s15  ;;  %s4146_s17 = scalar_lea.vmem %s4145_s16, 32 }
  0x2f   : > { %3834 = vmatprep.subr.bf16.mxu0 %v3975_v12  ;;  %v559_v26 = vld [vmem:[%s5625_s2 + $0x198] sm:$0xff]  ;;  %v542_v27 = vld [vmem:[%s5625_s2 + $0x110] sm:$0xff]  ;;  %v3981_v29 = vld [vmem:[%s5624_s1 + $0x28] sm:$0xff]   ;;  %p4147_p2 = scmp.lt.s32.totalorder %s5581_s25, %s4145_s16  ;;  %p4148_p3 = scmp.lt.s32.totalorder %s4146_s17, %s4140_s15 }
  0x30   : > { %v543_v28 = vld [vmem:[%s5625_s2 + $0x118] sm:$0xff]  ;;  %v3982_v30 = vld [vmem:[%s5624_s1 + $0x30] sm:$0xff]   ;;  %v528_v31 = vld [vmem:[%s5625_s2 + $0xa0] sm:$0xff]  ;;  %p4142_p0 = pnand %p4141_p13, %p4307_p6 }
  0x31   : > { %3835 = vmatpush3.bf16.msra.mxu0 %v3975_v12  ;;  %v529_v32 = vld [vmem:[%s5625_s2 + $0xa8] sm:$0xff]  ;;  %v512_v33 = vld [vmem:[%s5625_s2 + $0x20] sm:$0xff]  ;;  %v3983_v35 = vld [vmem:[%s5624_s1 + $0x38] sm:$0xff]   ;;  %p4149_p4 = por %p4148_p3, %p4147_p2 }
  0x32   : > { %814 = vperm.xlu0 %3972, %v556_v13   ;;  %819 = vperm.xlu1 %3973, %v557_v14   ;;  %v513_v34 = vld [vmem:[%s5625_s2 + $0x28] sm:$0xff]  ;;  %v3984_v36 = vld [vmem:[%s5624_s1 + $0x40] sm:$0xff]   ;;  %v3986_v42 = vld [vmem:[%s5624_s1 + $0x50] sm:$0xff]   ;;  %p4143_p1 = pneg %p4142_p0 }
  0x33   : > { %v560_v37 = vld [vmem:[%s5625_s2 + $0x1a0] sm:$0xff]  ;;  %v561_v38 = vld [vmem:[%s5625_s2 + $0x1a8] sm:$0xff]  ;;  %v530_v43 = vld [vmem:[%s5625_s2 + $0xb0] sm:$0xff] }
  0x34   : > { %3837 = vmatmul.mubr.msk.bf16.vlgmr.msra.gmra.mrb[0].mxu0 %vm1064_vm0, %v3977_v17  ;;  %v544_v39 = vld [vmem:[%s5625_s2 + $0x120] sm:$0xff]  ;;  %v545_v40 = vld [vmem:[%s5625_s2 + $0x128] sm:$0xff]  ;;  %v531_v44 = vld [vmem:[%s5625_s2 + $0xb8] sm:$0xff]  ;;  %p4150_p5 = pnand %p4149_p4, %p4143_p1 }
  0x35   : > { %3840 = vmatprep.mubr.msk.bf16.mxu0 %vm1064_vm0, %v3978_v18  ;;  %v3985_v41 = vld [vmem:[%s5624_s1 + $0x48] sm:$0xff]   ;;  %v514_v45 = vld [vmem:[%s5625_s2 + $0x30] sm:$0xff]  ;;  %v515_v46 = vld [vmem:[%s5625_s2 + $0x38] sm:$0xff] }
  0x36   : > { %734 = vperm.xlu0 %3972, %v540_v15   ;;  %739 = vperm.xlu1 %3973, %v541_v16   ;;  %v3987_v47 = vld [vmem:[%s5624_s1 + $0x58] sm:$0xff]   ;;  %v3988_v48 = vld [vmem:[%s5624_s1 + $0x60] sm:$0xff]   ;;  %v562_v49 = vld [vmem:[%s5625_s2 + $0x1b0] sm:$0xff] }
  0x37   : > { %v563_v50 = vld [vmem:[%s5625_s2 + $0x1b8] sm:$0xff]  ;;  %v546_v51 = vld [vmem:[%s5625_s2 + $0x130] sm:$0xff]  ;;  %v3989_v53 = vld [vmem:[%s5624_s1 + $0x68] sm:$0xff]  }
  0x38   : > { %v547_v52 = vld [vmem:[%s5625_s2 + $0x138] sm:$0xff]  ;;  %v3990_v54 = vld [vmem:[%s5624_s1 + $0x70] sm:$0xff]   ;;  %v532_v55 = vld [vmem:[%s5625_s2 + $0xc0] sm:$0xff] }
  0x39   : > { %v533_v56 = vld [vmem:[%s5625_s2 + $0xc8] sm:$0xff]  ;;  %v516_v57 = vld [vmem:[%s5625_s2 + $0x40] sm:$0xff]  ;;  %v3991_v59 = vld [vmem:[%s5624_s1 + $0x78] sm:$0xff]  }
  0x3a   : > { %664 = vperm.xlu0 %3972, %v526_v19   ;;  %669 = vperm.xlu1 %3973, %v527_v20   ;;  %v517_v58 = vld [vmem:[%s5625_s2 + $0x48] sm:$0xff]  ;;  %v3992_v60 = vld [vmem:[%s5624_s1 + $0x80] sm:$0xff]   ;;  %v3994_v2 = vld [vmem:[%s5624_s1 + $0x90] sm:$0xff]  }
  0x3b   : > { %v564_v61 = vld [vmem:[%s5625_s2 + $0x1c0] sm:$0xff]  ;;  %v565_v62 = vld [vmem:[%s5625_s2 + $0x1c8] sm:$0xff]  ;;  %v534_v3 = vld [vmem:[%s5625_s2 + $0xd0] sm:$0xff] }
  0x3c   : > { %3841 = vmatmul.mubr.msk.bf16.gmra.mrb[4].mxu0 %vm1064_vm0, %v3979_v23  ;;  %v548_v63 = vld [vmem:[%s5625_s2 + $0x140] sm:$0xff]  ;;  %v549_v0 = vld [vmem:[%s5625_s2 + $0x148] sm:$0xff]  ;;  %v535_v4 = vld [vmem:[%s5625_s2 + $0xd8] sm:$0xff] }
  0x3d   : > { %3844 = vmatprep.mubr.msk.bf16.mxu0 %vm1064_vm0, %v3980_v24  ;;  %v3993_v1 = vld [vmem:[%s5624_s1 + $0x88] sm:$0xff]   ;;  %v518_v5 = vld [vmem:[%s5625_s2 + $0x50] sm:$0xff]  ;;  %v519_v6 = vld [vmem:[%s5625_s2 + $0x58] sm:$0xff] }
  0x3e   : > { %584 = vperm.xlu0 %3972, %v510_v21   ;;  %589 = vperm.xlu1 %3973, %v511_v22   ;;  %v3995_v7 = vld [vmem:[%s5624_s1 + $0x98] sm:$0xff]   ;;  %v3996_v8 = vld [vmem:[%s5624_s1 + $0xa0] sm:$0xff]   ;;  %v566_v9 = vld [vmem:[%s5625_s2 + $0x1d0] sm:$0xff] }
  0x3f   : > { %v567_v10 = vld [vmem:[%s5625_s2 + $0x1d8] sm:$0xff]  ;;  %v550_v11 = vld [vmem:[%s5625_s2 + $0x150] sm:$0xff]  ;;  %v3997_v13 = vld [vmem:[%s5624_s1 + $0xa8] sm:$0xff]  }
  0x40   : > { %v551_v12 = vld [vmem:[%s5625_s2 + $0x158] sm:$0xff]  ;;  %v3998_v14 = vld [vmem:[%s5624_s1 + $0xb0] sm:$0xff]   ;;  %v536_v15 = vld [vmem:[%s5625_s2 + $0xe0] sm:$0xff] }
  0x41   : > { %v537_v16 = vld [vmem:[%s5625_s2 + $0xe8] sm:$0xff]  ;;  %v520_v17 = vld [vmem:[%s5625_s2 + $0x60] sm:$0xff]  ;;  %v3999_v19 = vld [vmem:[%s5624_s1 + $0xb8] sm:$0xff]  }
  0x42   : > { %824 = vperm.xlu0 %3972, %v558_v25   ;;  %829 = vperm.xlu1 %3973, %v559_v26   ;;  %v521_v18 = vld [vmem:[%s5625_s2 + $0x68] sm:$0xff]  ;;  %v4000_v20 = vld [vmem:[%s5624_s1 + $0xc0] sm:$0xff]   ;;  %v4002_v26 = vld [vmem:[%s5624_s1 + $0xd0] sm:$0xff]  }
  0x43   : > { %v568_v21 = vld [vmem:[%s5625_s2 + $0x1e0] sm:$0xff]  ;;  %v569_v22 = vld [vmem:[%s5625_s2 + $0x1e8] sm:$0xff] }
  0x44   : > { %3845 = vmatmul.mubr.msk.bf16.gmra.mrb[8].mxu0 %vm1064_vm0, %v3981_v29  ;;  %v552_v23 = vld [vmem:[%s5625_s2 + $0x160] sm:$0xff]  ;;  %v553_v24 = vld [vmem:[%s5625_s2 + $0x168] sm:$0xff]  ;;  %v522_v29 = vld [vmem:[%s5625_s2 + $0x70] sm:$0xff] }
  0x45   : > { %3848 = vmatprep.mubr.msk.bf16.mxu0 %vm1064_vm0, %v3982_v30  ;;  %v4001_v25 = vld [vmem:[%s5624_s1 + $0xc8] sm:$0xff]   ;;  %v523_v30 = vld [vmem:[%s5625_s2 + $0x78] sm:$0xff] }
  0x46   : > { %744 = vperm.xlu0 %3972, %v542_v27   ;;  %749 = vperm.xlu1 %3973, %v543_v28   ;;  %v538_v27 = vld [vmem:[%s5625_s2 + $0xf0] sm:$0xff]  ;;  %v539_v28 = vld [vmem:[%s5625_s2 + $0xf8] sm:$0xff] }
  0x4a   : > { %674 = vperm.xlu0 %3972, %v528_v31   ;;  %679 = vperm.xlu1 %3973, %v529_v32   ;;  %v4003_v31 = vld [vmem:[%s5624_s1 + $0xd8] sm:$0xff]   ;;  %v4004_v32 = vld [vmem:[%s5624_s1 + $0xe0] sm:$0xff]  }
  0x4c   : > { %3849 = vmatmul.mubr.msk.bf16.gmra.mrb[12].mxu0 %vm1064_vm0, %v3983_v35  ;;  %v554_v35 = vld [vmem:[%s5625_s2 + $0x170] sm:$0xff] }
  0x4d   : > { %3852 = vmatprep.mubr.msk.bf16.mxu0 %vm1064_vm0, %v3984_v36  ;;  %v555_v36 = vld [vmem:[%s5625_s2 + $0x178] sm:$0xff] }
  0x4e   : > { %594 = vperm.xlu0 %3972, %v512_v33   ;;  %599 = vperm.xlu1 %3973, %v513_v34   ;;  %v570_v33 = vld [vmem:[%s5625_s2 + $0x1f0] sm:$0xff]  ;;  %v571_v34 = vld [vmem:[%s5625_s2 + $0x1f8] sm:$0xff] }
  0x52   : > { %834 = vperm.xlu0 %3972, %v560_v37   ;;  %839 = vperm.xlu1 %3973, %v561_v38   ;;  %v4005_v37 = vld [vmem:[%s5624_s1 + $0xe8] sm:$0xff]   ;;  %v4006_v38 = vld [vmem:[%s5624_s1 + $0xf0] sm:$0xff]  }
  0x54   : > { %3853 = vmatmul.mubr.msk.bf16.gmra.mrb[16].mxu0 %vm1064_vm0, %v3985_v41 }
  0x55   : > { %3856 = vmatprep.mubr.msk.bf16.mxu0 %vm1064_vm0, %v3986_v42 }
  0x56   : > { %754 = vperm.xlu0 %3972, %v544_v39   ;;  %759 = vperm.xlu1 %3973, %v545_v40   ;;  %v1626_v39 = vld [vmem:[%s5627_s4 + $0x80] sm:$0xff]  ;;  %v1627_v40 = vld [vmem:[%s5627_s4 + $0x88] sm:$0xff] }
  0x5a   : > { %684 = vperm.xlu0 %3972, %v530_v43   ;;  %689 = vperm.xlu1 %3973, %v531_v44   ;;  %v1610_v43 = vld [vmem:[%s5627_s4] sm:$0xff]  ;;  %v1611_v44 = vld [vmem:[%s5627_s4 + $0x8] sm:$0xff] }
  0x5c   : > { %3857 = vmatmul.mubr.msk.bf16.gmra.mrb[20].mxu0 %vm1064_vm0, %v3987_v47 }
  0x5d   : > { %3860 = vmatprep.mubr.msk.bf16.mxu0 %vm1064_vm0, %v3988_v48  ;;  %v1628_v48 = vld [vmem:[%s5627_s4 + $0x90] sm:$0xff] }
  0x5e   : > { %604 = vperm.xlu0 %3972, %v514_v45   ;;  %609 = vperm.xlu1 %3973, %v515_v46   ;;  %v4007_v45 = vld [vmem:[%s5624_s1 + $0xf8] sm:$0xff]  }
  0x62   : > { %844 = vperm.xlu0 %3972, %v562_v49   ;;  %849 = vperm.xlu1 %3973, %v563_v50   ;;  %v1629_v49 = vld [vmem:[%s5627_s4 + $0x98] sm:$0xff] }
  0x64   : > { %3861 = vmatmul.mubr.msk.bf16.gmra.mrb[24].mxu0 %vm1064_vm0, %v3989_v53  ;;  %v1613_v53 = vld [vmem:[%s5627_s4 + $0x18] sm:$0xff] }
  0x65   : > { %3864 = vmatprep.mubr.msk.bf16.mxu0 %vm1064_vm0, %v3990_v54 }
  0x66   : > { %764 = vperm.xlu0 %3972, %v546_v51   ;;  %769 = vperm.xlu1 %3973, %v547_v52   ;;  %v1612_v52 = vld [vmem:[%s5627_s4 + $0x10] sm:$0xff] }
  0x6a   : > { %694 = vperm.xlu0 %3972, %v532_v55   ;;  %699 = vperm.xlu1 %3973, %v533_v56   ;;  %v1630_v56 = vld [vmem:[%s5627_s4 + $0xa0] sm:$0xff] }
  0x6c   : > { %3865 = vmatmul.mubr.msk.bf16.gmra.mrb[28].mxu0 %vm1064_vm0, %v3991_v59 }
  0x6d   : > { %3868 = vmatprep.mubr.msk.bf16.mxu0 %vm1064_vm0, %v3992_v60  ;;  %v1614_v60 = vld [vmem:[%s5627_s4 + $0x20] sm:$0xff] }
  0x6e   : > { %614 = vperm.xlu0 %3972, %v516_v57   ;;  %619 = vperm.xlu1 %3973, %v517_v58   ;;  %v1631_v57 = vld [vmem:[%s5627_s4 + $0xa8] sm:$0xff] }
  0x72   : > { %854 = vperm.xlu0 %3972, %v564_v61   ;;  %859 = vperm.xlu1 %3973, %v565_v62   ;;  %v1615_v61 = vld [vmem:[%s5627_s4 + $0x28] sm:$0xff] }
  0x74   : > { %3869 = vmatmul.mubr.msk.bf16.gmra.mrb[32].mxu0 %vm1064_vm0, %v3993_v1  ;;  %v1633_v1 = vld [vmem:[%s5627_s4 + $0xb8] sm:$0xff] }
  0x75   : > { %3872 = vmatprep.mubr.msk.bf16.mxu0 %vm1064_vm0, %v3994_v2 }
  0x76   : > { %774 = vperm.xlu0 %3972, %v548_v63   ;;  %779 = vperm.xlu1 %3973, %v549_v0   ;;  %v1632_v0 = vld [vmem:[%s5627_s4 + $0xb0] sm:$0xff] }
  0x7a   : > { %704 = vperm.xlu0 %3972, %v534_v3   ;;  %709 = vperm.xlu1 %3973, %v535_v4   ;;  %v1616_v4 = vld [vmem:[%s5627_s4 + $0x30] sm:$0xff] }
  0x7c   : > { %3873 = vmatmul.mubr.msk.bf16.gmra.mrb[36].mxu0 %vm1064_vm0, %v3995_v7 }
  0x7d   : > { %3876 = vmatprep.mubr.msk.bf16.mxu0 %vm1064_vm0, %v3996_v8  ;;  %v1634_v8 = vld [vmem:[%s5627_s4 + $0xc0] sm:$0xff] }
  0x7e   : > { %624 = vperm.xlu0 %3972, %v518_v5   ;;  %629 = vperm.xlu1 %3973, %v519_v6   ;;  %v1617_v5 = vld [vmem:[%s5627_s4 + $0x38] sm:$0xff] }
  0x82   : > { %864 = vperm.xlu0 %3972, %v566_v9   ;;  %869 = vperm.xlu1 %3973, %v567_v10   ;;  %v1635_v9 = vld [vmem:[%s5627_s4 + $0xc8] sm:$0xff] }
  0x84   : > { %3877 = vmatmul.mubr.msk.bf16.gmra.mrb[40].mxu0 %vm1064_vm0, %v3997_v13  ;;  %v1619_v13 = vld [vmem:[%s5627_s4 + $0x48] sm:$0xff] }
  0x85   : > { %3880 = vmatprep.mubr.msk.bf16.mxu0 %vm1064_vm0, %v3998_v14 }
  0x86   : > { %784 = vperm.xlu0 %3972, %v550_v11   ;;  %789 = vperm.xlu1 %3973, %v551_v12   ;;  %v1618_v12 = vld [vmem:[%s5627_s4 + $0x40] sm:$0xff] }
  0x8a   : > { %714 = vperm.xlu0 %3972, %v536_v15   ;;  %719 = vperm.xlu1 %3973, %v537_v16   ;;  %v1636_v16 = vld [vmem:[%s5627_s4 + $0xd0] sm:$0xff] }
  0x8c   : > { %3881 = vmatmul.mubr.msk.bf16.gmra.mrb[44].mxu0 %vm1064_vm0, %v3999_v19 }
  0x8d   : > { %3884 = vmatprep.mubr.msk.bf16.mxu0 %vm1064_vm0, %v4000_v20  ;;  %v4010_v20 = vld [vmem:[%s5626_s3 + $0x4] ss:$16 sps:$4 sm:$0xff]  }
  0x8e   : > { %634 = vperm.xlu0 %3972, %v520_v17   ;;  %639 = vperm.xlu1 %3973, %v521_v18   ;;  %v1637_v17 = vld [vmem:[%s5627_s4 + $0xd8] sm:$0xff] }
  0x8f   : > { %2154 = vmatprep.mubr.bf16.mxu1 %v4010_v20  ;;  %v2519_v20 = vld [vmem:[%s5629_s6 + $0x58] sm:$0xff] }
  0x92   : > { %874 = vperm.xlu0 %3972, %v568_v21   ;;  %879 = vperm.xlu1 %3973, %v569_v22   ;;  %v1620_v21 = vld [vmem:[%s5627_s4 + $0x50] sm:$0xff]  ;;  %v1621_v22 = vld [vmem:[%s5627_s4 + $0x58] sm:$0xff] }
  0x94   : > { %3885 = vmatmul.mubr.msk.bf16.gmra.mrb[48].mxu0 %vm1064_vm0, %v4001_v25  ;;  %v1638_v25 = vld [vmem:[%s5627_s4 + $0xe0] sm:$0xff] }
  0x95   : > { %3888 = vmatprep.mubr.msk.bf16.mxu0 %vm1064_vm0, %v4002_v26  ;;  %v1639_v26 = vld [vmem:[%s5627_s4 + $0xe8] sm:$0xff] }
  0x96   : > { %794 = vperm.xlu0 %3972, %v552_v23   ;;  %799 = vperm.xlu1 %3973, %v553_v24  }
  0x9a   : > { %724 = vperm.xlu0 %3972, %v538_v27   ;;  %729 = vperm.xlu1 %3973, %v539_v28  }
  0x9c   : > { %3889 = vmatmul.mubr.msk.bf16.gmra.mrb[52].mxu0 %vm1064_vm0, %v4003_v31 }
  0x9d   : > { %3892 = vmatprep.mubr.msk.bf16.mxu0 %vm1064_vm0, %v4004_v32 }
  0x9e   : > { %644 = vperm.xlu0 %3972, %v522_v29   ;;  %649 = vperm.xlu1 %3973, %v523_v30   ;;  %v1622_v29 = vld [vmem:[%s5627_s4 + $0x60] sm:$0xff]  ;;  %v1623_v30 = vld [vmem:[%s5627_s4 + $0x68] sm:$0xff] }
  0xa2   : > { %884 = vperm.xlu0 %3972, %v570_v33   ;;  %889 = vperm.xlu1 %3973, %v571_v34   ;;  %v1640_v33 = vld [vmem:[%s5627_s4 + $0xf0] sm:$0xff]  ;;  %v1641_v34 = vld [vmem:[%s5627_s4 + $0xf8] sm:$0xff] }
  0xa4   : > { %3893 = vmatmul.mubr.msk.bf16.gmra.mrb[56].mxu0 %vm1064_vm0, %v4005_v37  ;;  %v1624_v37 = vld [vmem:[%s5627_s4 + $0x70] sm:$0xff] }
  0xa5   : > { %3896 = vmatprep.mubr.msk.bf16.mxu0 %vm1064_vm0, %v4006_v38  ;;  %v1625_v38 = vld [vmem:[%s5627_s4 + $0x78] sm:$0xff] }
  0xa6   : > { %804 = vperm.xlu0 %3972, %v554_v35   ;;  %809 = vperm.xlu1 %3973, %v555_v36  }
  0xa9   : > { %v4651_v41 = vpop.permute.xlu0 %654  ;;  %v4653_v42 = vpop.permute.xlu1 %574 }
  0xaa   : > { %1724 = vperm.xlu0 %3972, %v1626_v39   ;;  %1729 = vperm.xlu1 %3973, %v1627_v40  }
  0xac   : > { %3897 = vmatmul.mubr.msk.bf16.gmra.mrb[60].mxu0 %vm1064_vm0, %v4007_v45 }
  0xad   : > { %v4664_v46 = vpop.permute.xlu0 %659  ;;  %v4666_v47 = vpop.permute.xlu1 %579 }
  0xae   : > { %1644 = vperm.xlu0 %3972, %v1610_v43   ;;  %1649 = vperm.xlu1 %3973, %v1611_v44   ;;  %v2508_v43 = vld [vmem:[%s5629_s6] sm:$0xff]  ;;  %v2509_v44 = vld [vmem:[%s5629_s6 + $0x8] sm:$0xff] }
  0xb1   : > { %v4675_v50 = vpop.permute.xlu0 %814  ;;  %v4677_v51 = vpop.permute.xlu1 %819 }
  0xb2   : > { %1734 = vperm.xlu0 %3972, %v1628_v48   ;;  %1739 = vperm.xlu1 %3973, %v1629_v49   ;;  %v2510_v49 = vld [vmem:[%s5629_s6 + $0x10] sm:$0xff] }
  0xb5   : > { %v4685_v54 = vpop.permute.xlu0 %734  ;;  %v4687_v55 = vpop.permute.xlu1 %739 }
  0xb6   : > { %1654 = vperm.xlu0 %3972, %v1612_v52   ;;  %1659 = vperm.xlu1 %3973, %v1613_v53   ;;  %v2511_v52 = vld [vmem:[%s5629_s6 + $0x18] sm:$0xff] }
  0xb9   : > { %v4695_v58 = vpop.permute.xlu0 %664  ;;  %v4697_v59 = vpop.permute.xlu1 %669 }
  0xba   : > { %1744 = vperm.xlu0 %3972, %v1630_v56   ;;  %1749 = vperm.xlu1 %3973, %v1631_v57   ;;  %v2512_v57 = vld [vmem:[%s5629_s6 + $0x20] sm:$0xff] }
  0xbd   : > { %v4705_v62 = vpop.permute.xlu0 %584  ;;  %v4707_v63 = vpop.permute.xlu1 %589 }
  0xbe   : > { %1664 = vperm.xlu0 %3972, %v1614_v60   ;;  %1669 = vperm.xlu1 %3973, %v1615_v61   ;;  %v2513_v60 = vld [vmem:[%s5629_s6 + $0x28] sm:$0xff] }
  0xc1   : > { %v4715_v2 = vpop.permute.xlu0 %824  ;;  %v4717_v3 = vpop.permute.xlu1 %829 }
  0xc2   : > { %1754 = vperm.xlu0 %3972, %v1632_v0   ;;  %1759 = vperm.xlu1 %3973, %v1633_v1   ;;  %v2514_v1 = vld [vmem:[%s5629_s6 + $0x30] sm:$0xff] }
  0xc5   : > { %v4725_v6 = vpop.permute.xlu0 %744  ;;  %v4727_v7 = vpop.permute.xlu1 %749 }
  0xc6   : > { %1674 = vperm.xlu0 %3972, %v1616_v4   ;;  %1679 = vperm.xlu1 %3973, %v1617_v5   ;;  %v2515_v4 = vld [vmem:[%s5629_s6 + $0x38] sm:$0xff] }
  0xc9   : > { %v4735_v10 = vpop.permute.xlu0 %674  ;;  %v4737_v11 = vpop.permute.xlu1 %679 }
  0xca   : > { %1764 = vperm.xlu0 %3972, %v1634_v8   ;;  %1769 = vperm.xlu1 %3973, %v1635_v9   ;;  %v2516_v9 = vld [vmem:[%s5629_s6 + $0x40] sm:$0xff] }
  0xcd   : > { %v4745_v14 = vpop.permute.xlu0 %594  ;;  %v4747_v15 = vpop.permute.xlu1 %599 }
  0xce   : > { %1684 = vperm.xlu0 %3972, %v1618_v12   ;;  %1689 = vperm.xlu1 %3973, %v1619_v13   ;;  %v2517_v12 = vld [vmem:[%s5629_s6 + $0x48] sm:$0xff] }
  0xd1   : > { %v4755_v18 = vpop.permute.xlu0 %834  ;;  %v4757_v19 = vpop.permute.xlu1 %839 }
  0xd2   : > { %1774 = vperm.xlu0 %3972, %v1636_v16   ;;  %1779 = vperm.xlu1 %3973, %v1637_v17   ;;  %v2518_v17 = vld [vmem:[%s5629_s6 + $0x50] sm:$0xff] }
  0xd5   : > { %v4768_v23 = vpop.permute.xlu0 %754  ;;  %v4770_v24 = vpop.permute.xlu1 %759 }
  0xd6   : > { %1694 = vperm.xlu0 %3972, %v1620_v21   ;;  %1699 = vperm.xlu1 %3973, %v1621_v22  }
  0xd9   : > { %v4778_v27 = vpop.permute.xlu0 %684  ;;  %v4780_v28 = vpop.permute.xlu1 %689 }
  0xda   : > { %1784 = vperm.xlu0 %3972, %v1638_v25   ;;  %1789 = vperm.xlu1 %3973, %v1639_v26   ;;  %v2520_v25 = vld [vmem:[%s5629_s6 + $0x60] sm:$0xff]  ;;  %v2521_v26 = vld [vmem:[%s5629_s6 + $0x68] sm:$0xff] }
  0xdd   : > { %v4788_v31 = vpop.permute.xlu0 %604  ;;  %v4790_v32 = vpop.permute.xlu1 %609 }
  0xde   : > { %1704 = vperm.xlu0 %3972, %v1622_v29   ;;  %1709 = vperm.xlu1 %3973, %v1623_v30  }
  0xe1   : > { %v4798_v35 = vpop.permute.xlu0 %844  ;;  %v4800_v36 = vpop.permute.xlu1 %849 }
  0xe2   : > { %1794 = vperm.xlu0 %3972, %v1640_v33   ;;  %1799 = vperm.xlu1 %3973, %v1641_v34   ;;  %v2522_v33 = vld [vmem:[%s5629_s6 + $0x70] sm:$0xff]  ;;  %v2523_v34 = vld [vmem:[%s5629_s6 + $0x78] sm:$0xff] }
  0xe5   : > { %v4808_v39 = vpop.permute.xlu0 %764  ;;  %v4810_v40 = vpop.permute.xlu1 %769 }
  0xe6   : > { %1714 = vperm.xlu0 %3972, %v1624_v37   ;;  %1719 = vperm.xlu1 %3973, %v1625_v38  }
  0xe9   : > { %v4818_v45 = vpop.permute.xlu0 %694  ;;  %v4820_v48 = vpop.permute.xlu1 %699 }
  0xea   : > { %2526 = vperm.xlu0 %3972, %v2508_v43   ;;  %2531 = vperm.xlu1 %3973, %v2509_v44   ;;  %v2821_v43 = vld [vmem:[%s5631_s8] sm:$0xff]  ;;  %v2822_v44 = vld [vmem:[%s5631_s8 + $0x8] sm:$0xff] }
  0xed   : > { %v4828_v53 = vpop.permute.xlu0 %614  ;;  %v4830_v56 = vpop.permute.xlu1 %619 }
  0xee   : > { %2536 = vperm.xlu0 %3972, %v2510_v49   ;;  %2541 = vperm.xlu1 %3973, %v2511_v52  }
  0xf1   : > { %v4838_v61 = vpop.permute.xlu0 %854  ;;  %v4840_v0 = vpop.permute.xlu1 %859 }
  0xf2   : > { %5637 = vst [vmem:[#allocation7_spill] sm:$0xff] %v4840_v0  ;;  %2546 = vperm.xlu0 %3972, %v2512_v57   ;;  %2551 = vperm.xlu1 %3973, %v2513_v60  }
  0xf5   : > { %v4848_v5 = vpop.permute.xlu0 %774  ;;  %v4850_v8 = vpop.permute.xlu1 %779 }
  0xf6   : > { %2556 = vperm.xlu0 %3972, %v2514_v1   ;;  %2561 = vperm.xlu1 %3973, %v2515_v4   ;;  %v2823_v4 = vld [vmem:[%s5631_s8 + $0x10] sm:$0xff] }
  0xf9   : > { %v4858_v13 = vpop.permute.xlu0 %704  ;;  %v4860_v16 = vpop.permute.xlu1 %709 }
  0xfa   : > { %2566 = vperm.xlu0 %3972, %v2516_v9   ;;  %2571 = vperm.xlu1 %3973, %v2517_v12   ;;  %v2824_v9 = vld [vmem:[%s5631_s8 + $0x18] sm:$0xff] }
  0xfd   : > { %v4868_v21 = vpop.permute.xlu0 %624  ;;  %v4870_v22 = vpop.permute.xlu1 %629 }
  0xfe   : > { %2576 = vperm.xlu0 %3972, %v2518_v17   ;;  %2581 = vperm.xlu1 %3973, %v2519_v20  }
 0x101   : > { %v4878_v29 = vpop.permute.xlu0 %864  ;;  %v4880_v30 = vpop.permute.xlu1 %869 }
 0x102   : > { %5638 = vst [vmem:[#allocation8_spill] sm:$0xff] %v4880_v30  ;;  %2586 = vperm.xlu0 %3972, %v2520_v25   ;;  %2591 = vperm.xlu1 %3973, %v2521_v26  }
 0x105   : > { %v4888_v37 = vpop.permute.xlu0 %784  ;;  %v4890_v38 = vpop.permute.xlu1 %789 }
 0x106   : > { %2596 = vperm.xlu0 %3972, %v2522_v33   ;;  %2601 = vperm.xlu1 %3973, %v2523_v34  }
 0x107   : > { %v3838_v57 = vpop.f32.mrb[0].mxu0 }
 0x108   : > { %v1204_v60 = vadd.f32 %v3838_v57, %v4705_v62  ;;  %v1195_v1 = vpop.f32.mrb[1].mxu0 }
 0x109   : > { %v4898_v49 = vpop.permute.xlu0 %714  ;;  %v4900_v52 = vpop.permute.xlu1 %719  ;;  %v1196_v12 = vadd.f32 %v1195_v1, %v4653_v42  ;;  %v2826_v42 = vld [vmem:[%s5631_s8 + $0x28] sm:$0xff] }
 0x10a   : > { %2839 = vperm.xlu0 %3972, %v2821_v43   ;;  %2844 = vperm.xlu1 %3973, %v2822_v44   ;;  %v3839_v17 = vpop.f32.mrb[2].mxu0  ;;  %v1452_v34 = vmax.f32 %v1204_v60, 0.0  ;;  %v2825_v44 = vld [vmem:[%s5631_s8 + $0x20] sm:$0xff] }
 0x10b   : > { %v1207_v20 = vadd.f32 %v3839_v17, %v4707_v63  ;;  %v1198_v25 = vpop.f32.mrb[3].mxu0  ;;  %v1450_v63 = vmax.f32 %v1196_v12, 0.0  ;;  %v3102_v12 = vld [vmem:[%s5632_s9] sm:$0xff] }
 0x10c   : > { %v1199_v33 = vadd.f32 %v1198_v25, %v4666_v47  ;;  %v4036_v47 = vld [vmem:[%s5626_s3 + $0xc] ss:$16 sps:$4 sm:$0xff]  }
 0x10d   : > { %v4911_v26 = vpop.permute.xlu0 %634  ;;  %v4914_v62 = vpop.permute.xlu1 %639  ;;  %v1453_v43 = vmax.f32 %v1207_v20, 0.0  ;;  %2315 = vmatprep.mubr.bf16.mxu0 %v4036_v47 }
 0x10e   : > { %2849 = vperm.xlu0 %3972, %v2823_v4   ;;  %2854 = vperm.xlu1 %3973, %v2824_v9   ;;  %v1451_v57 = vmax.f32 %v1199_v33, 0.0  ;;  %v3103_v33 = vld [vmem:[%s5632_s9 + $0x8] sm:$0xff] }
 0x10f   : > { %v4922_v1 = vpack.c.bf16 %v1453_v43, %v1452_v34  ;;  %v3842_v4 = vpop.f32.mrb[4].mxu0 }
 0x110   : > { %v4931_v9 = vpack.c.bf16 %v1451_v57, %v1450_v63  ;;  %v1220_v20 = vadd.f32 %v3842_v4, %v4788_v31  ;;  %v1211_v25 = vpop.f32.mrb[5].mxu0 }
 0x111   : > { %v4924_v17 = vpop.permute.xlu0 %874  ;;  %v4929_v60 = vpop.permute.xlu1 %879  ;;  %v1212_v34 = vadd.f32 %v1211_v25, %v4745_v14  ;;  %v2828_v14 = vld [vmem:[%s5631_s8 + $0x38] sm:$0xff] }
 0x112   : > { %5639 = vst [vmem:[#allocation9_spill] sm:$0xff] %v4924_v17  ;;  %5640 = vst [vmem:[#allocation10_spill] sm:$0xff] %v4929_v60  ;;  %2859 = vperm.xlu0 %3972, %v2825_v44   ;;  %2864 = vperm.xlu1 %3973, %v2826_v42   ;;  %v3843_v43 = vpop.f32.mrb[6].mxu0  ;;  %v1456_v31 = vmax.f32 %v1220_v20, 0.0  ;;  %v2827_v60 = vld [vmem:[%s5631_s8 + $0x30] sm:$0xff] }
 0x113   : > { %v1223_v44 = vadd.f32 %v3843_v43, %v4790_v32  ;;  %v1214_v42 = vpop.f32.mrb[7].mxu0  ;;  %v1454_v47 = vmax.f32 %v1212_v34, 0.0  ;;  %v3105_v34 = vld [vmem:[%s5632_s9 + $0x18] sm:$0xff] }
 0x114   : > { %v1215_v63 = vadd.f32 %v1214_v42, %v4747_v15 }
 0x115   : > { %v4943_v57 = vpop.permute.xlu0 %794  ;;  %v1457_v4 = vmax.f32 %v1223_v44, 0.0  ;;  %v4951_v32 = vpop.permute.xlu1 %799  ;;  %v3104_v44 = vld [vmem:[%s5632_s9 + $0x10] sm:$0xff] }
 0x116   : > { %3120 = vperm.xlu0 %3972, %v3102_v12   ;;  %3125 = vperm.xlu1 %3973, %v3103_v33   ;;  %v1455_v25 = vmax.f32 %v1215_v63, 0.0 }
 0x117   : > { %v4953_v43 = vpack.c.bf16 %v1457_v4, %v1456_v31  ;;  %v3846_v12 = vpop.f32.mrb[8].mxu0 }
 0x118   : > { %v4955_v15 = vpack.c.bf16 %v1455_v25, %v1454_v47  ;;  %v1236_v20 = vadd.f32 %v3846_v12, %v4868_v21  ;;  %v1227_v33 = vpop.f32.mrb[9].mxu0  ;;  %v2829_v12 = vld [vmem:[%s5631_s8 + $0x40] sm:$0xff] }
 0x119   : > { %v4964_v42 = vpop.permute.xlu0 %724  ;;  %v1228_v63 = vadd.f32 %v1227_v33, %v4828_v53  ;;  %v3847_v31 = vpop.f32.mrb[10].mxu0  ;;  %v2830_v53 = vld [vmem:[%s5631_s8 + $0x48] sm:$0xff] }
 0x11a   : > { %2869 = vperm.xlu0 %3972, %v2827_v60   ;;  %2874 = vperm.xlu1 %3973, %v2828_v14   ;;  %v1239_v4 = vadd.f32 %v3847_v31, %v4870_v22  ;;  %v1230_v60 = vpop.f32.mrb[11].mxu0  ;;  %v4968_v14 = vpop.permute.xlu1 %729  ;;  %v1460_v47 = vmax.f32 %v1236_v20, 0.0 }
 0x11b   : > { %v1231_v21 = vadd.f32 %v1230_v60, %v4830_v56  ;;  %v1458_v33 = vmax.f32 %v1228_v63, 0.0 }
 0x11c   : > { %v1461_v25 = vmax.f32 %v1239_v4, 0.0  ;;  %v3107_v4 = vld [vmem:[%s5632_s9 + $0x28] sm:$0xff] }
 0x11d   : > { %v1459_v17 = vmax.f32 %v1231_v21, 0.0  ;;  %v645_v0 = vpop.permute.xlu0 %644 }
 0x11e   : > { %3130 = vperm.xlu0 %3972, %v3104_v44   ;;  %3135 = vperm.xlu1 %3973, %v3105_v34   ;;  %v4977_v22 = vpack.c.bf16 %v1461_v25, %v1460_v47  ;;  %v3106_v34 = vld [vmem:[%s5632_s9 + $0x20] sm:$0xff]  ;;  %v650_v63 = vpop.permute.xlu1 %649 }
 0x11f   : > { %v4979_v31 = vpack.c.bf16 %v1459_v17, %v1458_v33  ;;  %v3850_v56 = vpop.f32.mrb[12].mxu0  ;;  %v2832_v33 = vld [vmem:[%s5631_s8 + $0x58] sm:$0xff] }
 0x120   : > { %v1252_v20 = vadd.f32 %v3850_v56, %v645_v0  ;;  %v1243_v44 = vpop.f32.mrb[13].mxu0 }
 0x121   : > { %v1244_v60 = vadd.f32 %v1243_v44, %v4911_v26  ;;  %v3851_v21 = vpop.f32.mrb[14].mxu0 }
 0x122   : > { %2879 = vperm.xlu0 %3972, %v2829_v12   ;;  %2884 = vperm.xlu1 %3973, %v2830_v53   ;;  %v1255_v17 = vadd.f32 %v3851_v21, %v650_v63  ;;  %v1246_v47 = vpop.f32.mrb[15].mxu0  ;;  %v1464_v0 = vmax.f32 %v1252_v20, 0.0  ;;  %v2831_v53 = vld [vmem:[%s5631_s8 + $0x50] sm:$0xff] }
 0x123   : > { %v1247_v25 = vadd.f32 %v1246_v47, %v4914_v62  ;;  %v1462_v56 = vmax.f32 %v1244_v60, 0.0 }
 0x124   : > { %v1465_v12 = vmax.f32 %v1255_v17, 0.0 }
 0x125   : > { %v1463_v30 = vmax.f32 %v1247_v25, 0.0 }
 0x126   : > { %3140 = vperm.xlu0 %3972, %v3106_v34   ;;  %3145 = vperm.xlu1 %3973, %v3107_v4   ;;  %v4995_v26 = vpack.c.bf16 %v1465_v12, %v1464_v0  ;;  %v3108_v34 = vld [vmem:[%s5632_s9 + $0x30] sm:$0xff]  ;;  %v3109_v4 = vld [vmem:[%s5632_s9 + $0x38] sm:$0xff]  ;;  %v2833_v0 = vld [vmem:[%s5631_s8 + $0x60] sm:$0xff] }
 0x127   : > { %v4997_v44 = vpack.c.bf16 %v1463_v30, %v1462_v56  ;;  %v3854_v63 = vpop.f32.mrb[16].mxu0  ;;  %v2834_v12 = vld [vmem:[%s5631_s8 + $0x68] sm:$0xff] }
 0x128   : > { %v1268_v62 = vadd.f32 %v3854_v63, %v4695_v58  ;;  %v1259_v20 = vpop.f32.mrb[17].mxu0 }
 0x129   : > { %v1260_v60 = vadd.f32 %v1259_v20, %v4651_v41  ;;  %v3855_v21 = vpop.f32.mrb[18].mxu0 }
 0x12a   : > { %2889 = vperm.xlu0 %3972, %v2831_v53   ;;  %2894 = vperm.xlu1 %3973, %v2832_v33   ;;  %v1271_v30 = vadd.f32 %v3855_v21, %v4697_v59  ;;  %v1262_v17 = vpop.f32.mrb[19].mxu0  ;;  %v1468_v58 = vmax.f32 %v1268_v62, 0.0  ;;  %v3110_v62 = vld [vmem:[%s5632_s9 + $0x40] sm:$0xff] }
 0x12b   : > { %v1263_v47 = vadd.f32 %v1262_v17, %v4664_v46  ;;  %v1466_v53 = vmax.f32 %v1260_v60, 0.0 }
 0x12c   : > { %v1469_v25 = vmax.f32 %v1271_v30, 0.0 }
 0x12d   : > { %v1467_v41 = vmax.f32 %v1263_v47, 0.0 }
 0x12e   : > { %3150 = vperm.xlu0 %3972, %v3108_v34   ;;  %3155 = vperm.xlu1 %3973, %v3109_v4   ;;  %v1523_v33 = vpack.c.bf16 %v1469_v25, %v1468_v58  ;;  %v3111_v4 = vld [vmem:[%s5632_s9 + $0x48] sm:$0xff] }
 0x12f   : > { %v3858_v56 = vpop.f32.mrb[20].mxu0  ;;  %v1522_v59 = vpack.c.bf16 %v1467_v41, %v1466_v53  ;;  %v3112_v53 = vld [vmem:[%s5632_s9 + $0x50] sm:$0xff] }
 0x130   : > { %v1284_v46 = vadd.f32 %v3858_v56, %v4778_v27  ;;  %v1275_v63 = vpop.f32.mrb[21].mxu0  ;;  %v3113_v56 = vld [vmem:[%s5632_s9 + $0x58] sm:$0xff] }
 0x131   : > { %v1276_v20 = vadd.f32 %v1275_v63, %v4735_v10  ;;  %v3859_v34 = vpop.f32.mrb[22].mxu0  ;;  %3528 = vmatprep.subr.bf16.mxu1 %v1522_v59  ;;  %v2835_v10 = vld [vmem:[%s5631_s8 + $0x70] sm:$0xff] }
 0x132   : > { %2899 = vperm.xlu0 %3972, %v2833_v0   ;;  %2904 = vperm.xlu1 %3973, %v2834_v12   ;;  %v1287_v60 = vadd.f32 %v3859_v34, %v4780_v28  ;;  %v1278_v21 = vpop.f32.mrb[23].mxu0  ;;  %v1472_v30 = vmax.f32 %v1284_v46, 0.0  ;;  %v2836_v28 = vld [vmem:[%s5631_s8 + $0x78] sm:$0xff] }
 0x133   : > { %3529 = vmatpush3.bf16.msra.mxu1 %v4931_v9  ;;  %v1279_v27 = vadd.f32 %v1278_v21, %v4737_v11  ;;  %v1470_v47 = vmax.f32 %v1276_v20, 0.0  ;;  %v3116_v21 = vld [vmem:[%s5632_s9 + $0x70] sm:$0xff] }
 0x134   : > { %3530 = vmatprep.subr.bf16.mxu1 %v1523_v33  ;;  %v1473_v17 = vmax.f32 %v1287_v60, 0.0 }
 0x135   : > { %v1471_v58 = vmax.f32 %v1279_v27, 0.0 }
 0x136   : > { %3160 = vperm.xlu0 %3972, %v3110_v62   ;;  %3165 = vperm.xlu1 %3973, %v3111_v4   ;;  %v1525_v25 = vpack.c.bf16 %v1473_v17, %v1472_v30  ;;  %v3117_v17 = vld [vmem:[%s5632_s9 + $0x78] sm:$0xff] }
 0x137   : > { %3531 = vmatpush3.bf16.msra.mxu1 %v4922_v1  ;;  %v1524_v9 = vpack.c.bf16 %v1471_v58, %v1470_v47  ;;  %v3862_v11 = vpop.f32.mrb[24].mxu0 }
 0x138   : > { %v1300_v0 = vadd.f32 %v3862_v11, %v4858_v13  ;;  %v1291_v12 = vpop.f32.mrb[25].mxu0 }
 0x139   : > { %v1292_v41 = vadd.f32 %v1291_v12, %v4818_v45  ;;  %v3863_v33 = vpop.f32.mrb[26].mxu0  ;;  %3532 = vmatprep.subr.bf16.mxu1 %v1524_v9  ;;  %v3114_v45 = vld [vmem:[%s5632_s9 + $0x60] sm:$0xff] }
 0x13a   : > { %2909 = vperm.xlu0 %3972, %v2835_v10   ;;  %2914 = vperm.xlu1 %3973, %v2836_v28   ;;  %v1303_v1 = vadd.f32 %v3863_v33, %v4860_v16  ;;  %v1294_v59 = vpop.f32.mrb[27].mxu0  ;;  %v1476_v46 = vmax.f32 %v1300_v0, 0.0  ;;  %v3115_v16 = vld [vmem:[%s5632_s9 + $0x68] sm:$0xff]  ;;  %v3235_v28 = vld [vmem:[#allocation2] sm:$0x1] }
 0x13b   : > { %3533 = vmatpush3.bf16.msra.mxu1 %v4955_v15  ;;  %v1295_v13 = vadd.f32 %v1294_v59, %v4820_v48  ;;  %v1474_v62 = vmax.f32 %v1292_v41, 0.0 }
 0x13c   : > { %3534 = vmatprep.subr.bf16.mxu1 %v1525_v25  ;;  %v1477_v63 = vmax.f32 %v1303_v1, 0.0 }
 0x13d   : > { %v1475_v20 = vmax.f32 %v1295_v13, 0.0 }
 0x13e   : > { %3170 = vperm.xlu0 %3972, %v3112_v53   ;;  %3175 = vperm.xlu1 %3973, %v3113_v56   ;;  %v1527_v34 = vpack.c.bf16 %v1477_v63, %v1476_v46 }
 0x13f   : > { %3535 = vmatpush3.bf16.msra.mxu1 %v4953_v43  ;;  %v1526_v15 = vpack.c.bf16 %v1475_v20, %v1474_v62  ;;  %v3866_v48 = vpop.f32.mrb[28].mxu0 }
 0x140   : > { %v1316_v4 = vadd.f32 %v3866_v48, %v4964_v42  ;;  %v1307_v60 = vpop.f32.mrb[29].mxu0 }
 0x141   : > { %v1308_v27 = vadd.f32 %v1307_v60, %v4898_v49  ;;  %v3867_v30 = vpop.f32.mrb[30].mxu0  ;;  %3536 = vmatprep.subr.bf16.mxu1 %v1526_v15 }
 0x142   : > { %3180 = vperm.xlu0 %3972, %v3114_v45   ;;  %3185 = vperm.xlu1 %3973, %v3115_v16   ;;  %v1319_v43 = vadd.f32 %v3867_v30, %v4968_v14  ;;  %v1310_v10 = vpop.f32.mrb[31].mxu0  ;;  %v1480_v47 = vmax.f32 %v1316_v4, 0.0  ;;  %v4013_v4 = vld [vmem:[%s5626_s3 + $0x20] ss:$16 sps:$4 sm:$0xff]  }
 0x143   : > { %3537 = vmatpush3.bf16.msra.mxu1 %v4979_v31  ;;  %v1311_v42 = vadd.f32 %v1310_v10, %v4900_v52  ;;  %v1478_v49 = vmax.f32 %v1308_v27, 0.0  ;;  %v5094_v27 = vpop.permute.xlu0 %884 }
 0x144   : > { %3538 = vmatprep.subr.bf16.mxu1 %v1527_v34  ;;  %v1481_v58 = vmax.f32 %v1319_v43, 0.0 }
 0x145   : > { %v1479_v25 = vmax.f32 %v1311_v42, 0.0  ;;  %v5098_v42 = vpop.permute.xlu1 %889 }
 0x146   : > { %3190 = vperm.xlu0 %3972, %v3116_v21   ;;  %3195 = vperm.xlu1 %3973, %v3117_v17   ;;  %v1529_v9 = vpack.c.bf16 %v1481_v58, %v1480_v47 }
 0x147   : > { %3539 = vmatpush3.bf16.msra.mxu1 %v4977_v22  ;;  %v1528_v11 = vpack.c.bf16 %v1479_v25, %v1478_v49  ;;  %v3870_v0 = vpop.f32.mrb[32].mxu0 }
 0x148   : > { %v1332_v14 = vadd.f32 %v3870_v0, %v4725_v6  ;;  %v1323_v12 = vpop.f32.mrb[33].mxu0  ;;  %v4008_v6 = vld [vmem:[%s5626_s3] ss:$16 sps:$4 sm:$0xff]  }
 0x149   : > { %v1324_v31 = vadd.f32 %v1323_v12, %v4685_v54  ;;  %v3871_v52 = vpop.f32.mrb[34].mxu0  ;;  %3540 = vmatprep.subr.bf16.mxu1 %v1528_v11  ;;  %v4011_v54 = vld [vmem:[%s5626_s3 + $0x24] ss:$16 sps:$4 sm:$0xff]   ;;  %v810_v12 = vpop.permute.xlu1 %809 }
 0x14a   : > { %3238 = vperm.xlu0 %3972, %v3235_v28   ;;  %v1335_v53 = vadd.f32 %v3871_v52, %v4727_v7  ;;  %v1326_v41 = vpop.f32.mrb[35].mxu0  ;;  %v1484_v56 = vmax.f32 %v1332_v14, 0.0 }
 0x14b   : > { %3541 = vmatpush3.bf16.msra.mxu1 %v4997_v44  ;;  %v1327_v33 = vadd.f32 %v1326_v41, %v4687_v55  ;;  %v1482_v1 = vmax.f32 %v1324_v31, 0.0 }
 0x14c   : > { %3542 = vmatprep.subr.bf16.mxu1 %v1529_v9  ;;  %v1485_v22 = vmax.f32 %v1335_v53, 0.0 }
 0x14d   : > { %v1483_v59 = vmax.f32 %v1327_v33, 0.0 }
 0x14e   : > { %v5071_v13 = vpack.c.bf16 %v1485_v22, %v1484_v56 }
 0x14f   : > { %3543 = vmatpush3.bf16.msra.mxu1 %v4995_v26  ;;  %v5077_v7 = vpack.c.bf16 %v1483_v59, %v1482_v1  ;;  %v3874_v55 = vpop.f32.mrb[36].mxu0 }
 0x150   : > { %v1348_v44 = vadd.f32 %v3874_v55, %v4808_v39  ;;  %v1339_v46 = vpop.f32.mrb[37].mxu0 }
 0x151   : > { %v1340_v63 = vadd.f32 %v1339_v46, %v4768_v23  ;;  %v3875_v45 = vpop.f32.mrb[38].mxu0  ;;  %v4014_v23 = vld [vmem:[%s5626_s3 + $0x44] ss:$16 sps:$4 sm:$0xff]  }
 0x152   : > { %2155 = vmatmul.mubr.bf16.vlgmr.msra.gmra.mrb[0].mxu1 %v4008_v6  ;;  %v1351_v62 = vadd.f32 %v3875_v45, %v4810_v40  ;;  %v1342_v20 = vpop.f32.mrb[39].mxu0  ;;  %v1488_v16 = vmax.f32 %v1348_v44, 0.0  ;;  %v4019_v6 = vld [vmem:[%s5626_s3 + $0x60] ss:$16 sps:$4 sm:$0xff]  }
 0x153   : > { %2162 = vmatprep.mubr.bf16.mxu1 %v4011_v54  ;;  %v1343_v26 = vadd.f32 %v1342_v20, %v4770_v24  ;;  %v1486_v15 = vmax.f32 %v1340_v63, 0.0 }
 0x154   : > { %v1489_v34 = vmax.f32 %v1351_v62, 0.0 }
 0x155   : > { %v1487_v48 = vmax.f32 %v1343_v26, 0.0 }
 0x156   : > { %v5086_v39 = vpack.c.bf16 %v1489_v34, %v1488_v16 }
 0x157   : > { %v5091_v60 = vpack.c.bf16 %v1487_v48, %v1486_v15  ;;  %v3878_v40 = vpop.f32.mrb[40].mxu0 }
 0x158   : > { %v1364_v21 = vadd.f32 %v3878_v40, %v4888_v37  ;;  %v1355_v24 = vpop.f32.mrb[41].mxu0  ;;  %v4016_v37 = vld [vmem:[%s5626_s3 + $0x40] ss:$16 sps:$4 sm:$0xff]  }
 0x159   : > { %v1356_v30 = vadd.f32 %v1355_v24, %v4848_v5  ;;  %v3879_v17 = vpop.f32.mrb[42].mxu0  ;;  %v4017_v5 = vld [vmem:[%s5626_s3 + $0x64] ss:$16 sps:$4 sm:$0xff]  }
 0x15a   : > { %2163 = vmatmul.mubr.bf16.gmra.mrb[4].mxu1 %v4013_v4  ;;  %v1367_v43 = vadd.f32 %v3879_v17, %v4890_v38  ;;  %v1358_v10 = vpop.f32.mrb[43].mxu0  ;;  %v1492_v58 = vmax.f32 %v1364_v21, 0.0  ;;  %v805_v38 = vpop.permute.xlu0 %804  ;;  %v4022_v4 = vld [vmem:[%s5626_s3 + $0x80] ss:$16 sps:$4 sm:$0xff]  }
 0x15b   : > { %2170 = vmatprep.mubr.bf16.mxu1 %v4014_v23  ;;  %v1359_v47 = vadd.f32 %v1358_v10, %v4850_v8  ;;  %v1490_v49 = vmax.f32 %v1356_v30, 0.0 }
 0x15c   : > { %v1493_v28 = vmax.f32 %v1367_v43, 0.0 }
 0x15d   : > { %v1491_v25 = vmax.f32 %v1359_v47, 0.0 }
 0x15e   : > { %v5104_v9 = vpack.c.bf16 %v1493_v28, %v1492_v58 }
 0x15f   : > { %v5109_v11 = vpack.c.bf16 %v1491_v25, %v1490_v49  ;;  %v3882_v0 = vpop.f32.mrb[44].mxu0 }
 0x160   : > { %v1380_v14 = vadd.f32 %v3882_v0, %v805_v38  ;;  %v1371_v8 = vpop.f32.mrb[45].mxu0  ;;  %v5641_v38 = vld [vmem:[#allocation8_spill] sm:$0xff] }
 0x161   : > { %v1372_v31 = vadd.f32 %v1371_v8, %v4943_v57  ;;  %v3883_v52 = vpop.f32.mrb[46].mxu0  ;;  %v4020_v57 = vld [vmem:[%s5626_s3 + $0x84] ss:$16 sps:$4 sm:$0xff]  }
 0x162   : > { %2171 = vmatmul.mubr.bf16.gmra.mrb[8].mxu1 %v4016_v37  ;;  %v1383_v53 = vadd.f32 %v3883_v52, %v810_v12  ;;  %v1374_v41 = vpop.f32.mrb[47].mxu0  ;;  %v1496_v56 = vmax.f32 %v1380_v14, 0.0 }
 0x163   : > { %2178 = vmatprep.mubr.bf16.mxu1 %v4017_v5  ;;  %v1375_v33 = vadd.f32 %v1374_v41, %v4951_v32  ;;  %v1494_v1 = vmax.f32 %v1372_v31, 0.0  ;;  %v4029_v41 = vld [vmem:[%s5626_s3 + $0xe4] ss:$16 sps:$4 sm:$0xff]  }
 0x164   : > { %v1497_v22 = vmax.f32 %v1383_v53, 0.0 }
 0x165   : > { %v1495_v59 = vmax.f32 %v1375_v33, 0.0 }
 0x166   : > { %v5116_v54 = vpack.c.bf16 %v1497_v22, %v1496_v56 }
 0x167   : > { %v5121_v55 = vpack.c.bf16 %v1495_v59, %v1494_v1  ;;  %v3886_v44 = vpop.f32.mrb[48].mxu0  ;;  %v5643_v1 = vld [vmem:[#allocation9_spill] sm:$0xff] }
 0x168   : > { %v1396_v46 = vadd.f32 %v3886_v44, %v4715_v2  ;;  %v1387_v32 = vpop.f32.mrb[49].mxu0 }
 0x169   : > { %v1388_v63 = vadd.f32 %v1387_v32, %v4675_v50  ;;  %v3887_v45 = vpop.f32.mrb[50].mxu0  ;;  %v4023_v50 = vld [vmem:[%s5626_s3 + $0xa4] ss:$16 sps:$4 sm:$0xff]  }
 0x16a   : > { %2179 = vmatmul.mubr.bf16.gmra.mrb[12].mxu1 %v4019_v6  ;;  %v1399_v62 = vadd.f32 %v3887_v45, %v4717_v3  ;;  %v1390_v20 = vpop.f32.mrb[51].mxu0  ;;  %v1500_v16 = vmax.f32 %v1396_v46, 0.0 }
 0x16b   : > { %2186 = vmatprep.mubr.bf16.mxu1 %v4020_v57  ;;  %v1391_v26 = vadd.f32 %v1390_v20, %v4677_v51  ;;  %v1498_v15 = vmax.f32 %v1388_v63, 0.0 }
 0x16c   : > { %v1501_v34 = vmax.f32 %v1399_v62, 0.0 }
 0x16d   : > { %v1499_v48 = vmax.f32 %v1391_v26, 0.0  ;;  %v4034_v26 = vld [vmem:[%s5626_s3 + $0x8] ss:$16 sps:$4 sm:$0xff]  }
 0x16e   : > { %v1539_v2 = vpack.c.bf16 %v1501_v34, %v1500_v16  ;;  %v4037_v16 = vld [vmem:[%s5626_s3 + $0x100] ss:$16 sps:$4 sm:$0xff]  }
 0x16f   : > { %v1538_v23 = vpack.c.bf16 %v1499_v48, %v1498_v15  ;;  %v3890_v40 = vpop.f32.mrb[52].mxu0  ;;  %v4042_v34 = vld [vmem:[%s5626_s3 + $0x120] ss:$16 sps:$4 sm:$0xff]   ;;  %v4044_v15 = vld [vmem:[%s5626_s3 + $0x144] ss:$16 sps:$4 sm:$0xff]  }
 0x170   : > { %v1412_v3 = vadd.f32 %v3890_v40, %v4798_v35  ;;  %v1403_v21 = vpop.f32.mrb[53].mxu0  ;;  %v4046_v48 = vld [vmem:[%s5626_s3 + $0x4c] ss:$16 sps:$4 sm:$0xff]   ;;  %v4054_v40 = vld [vmem:[%s5626_s3 + $0x160] ss:$16 sps:$4 sm:$0xff]  }
 0x171   : > { %v1404_v51 = vadd.f32 %v1403_v21, %v4755_v18  ;;  %v3891_v24 = vpop.f32.mrb[54].mxu0  ;;  %3640 = vmatprep.subr.bf16.mxu0 %v1538_v23  ;;  %v4025_v18 = vld [vmem:[%s5626_s3 + $0xa0] ss:$16 sps:$4 sm:$0xff]   ;;  %v4052_v23 = vld [vmem:[%s5626_s3 + $0x6c] ss:$16 sps:$4 sm:$0xff]  }
 0x172   : > { %2187 = vmatmul.mubr.bf16.gmra.mrb[16].mxu1 %v4022_v4  ;;  %v1415_v30 = vadd.f32 %v3891_v24, %v4800_v36  ;;  %v1406_v17 = vpop.f32.mrb[55].mxu0  ;;  %3641 = vmatpush3.bf16.msra.mxu0 %v5077_v7  ;;  %v1504_v10 = vmax.f32 %v1412_v3, 0.0  ;;  %v4026_v36 = vld [vmem:[%s5626_s3 + $0xc4] ss:$16 sps:$4 sm:$0xff]   ;;  %v4048_v4 = vld [vmem:[%s5626_s3 + $0x140] ss:$16 sps:$4 sm:$0xff]  }
 0x173   : > { %2194 = vmatprep.mubr.bf16.mxu1 %v4023_v50  ;;  %v1407_v43 = vadd.f32 %v1406_v17, %v4757_v19  ;;  %3642 = vmatprep.subr.bf16.mxu0 %v1539_v2  ;;  %v1502_v58 = vmax.f32 %v1404_v51, 0.0  ;;  %v4049_v2 = vld [vmem:[%s5626_s3 + $0x48] ss:$16 sps:$4 sm:$0xff]   ;;  %v4050_v50 = vld [vmem:[%s5626_s3 + $0x164] ss:$16 sps:$4 sm:$0xff]  }
 0x174   : > { %v1505_v47 = vmax.f32 %v1415_v30, 0.0  ;;  %v4055_v3 = vld [vmem:[%s5626_s3 + $0x68] ss:$16 sps:$4 sm:$0xff]   ;;  %v4056_v21 = vld [vmem:[%s5626_s3 + $0x184] ss:$16 sps:$4 sm:$0xff]  }
 0x175   : > { %v1503_v28 = vmax.f32 %v1407_v43, 0.0  ;;  %v4058_v51 = vld [vmem:[%s5626_s3 + $0x8c] ss:$16 sps:$4 sm:$0xff]   ;;  %v4060_v24 = vld [vmem:[%s5626_s3 + $0x180] ss:$16 sps:$4 sm:$0xff]  }
 0x176   : > { %v1541_v35 = vpack.c.bf16 %v1505_v47, %v1504_v10  ;;  %3643 = vmatpush3.bf16.msra.mxu0 %v5071_v13  ;;  %v5642_v13 = vld [vmem:[#allocation7_spill] sm:$0xff]  ;;  %v4064_v43 = vld [vmem:[%s5626_s3 + $0xac] ss:$16 sps:$4 sm:$0xff]  }
 0x177   : > { %v1540_v7 = vpack.c.bf16 %v1503_v28, %v1502_v58  ;;  %v3894_v49 = vpop.f32.mrb[56].mxu0  ;;  %v4061_v30 = vld [vmem:[%s5626_s3 + $0x88] ss:$16 sps:$4 sm:$0xff]   ;;  %v4062_v17 = vld [vmem:[%s5626_s3 + $0x1a4] ss:$16 sps:$4 sm:$0xff]  }
 0x178   : > { %v1428_v19 = vadd.f32 %v3894_v49, %v4878_v29  ;;  %v1419_v25 = vpop.f32.mrb[57].mxu0  ;;  %v4066_v10 = vld [vmem:[%s5626_s3 + $0x1a0] ss:$16 sps:$4 sm:$0xff]   ;;  %v4067_v47 = vld [vmem:[%s5626_s3 + $0xa8] ss:$16 sps:$4 sm:$0xff]  }
 0x179   : > { %v1420_v37 = vadd.f32 %v1419_v25, %v4838_v61  ;;  %v3895_v5 = vpop.f32.mrb[58].mxu0  ;;  %3644 = vmatprep.subr.bf16.mxu0 %v1540_v7  ;;  %v4028_v61 = vld [vmem:[%s5626_s3 + $0xc0] ss:$16 sps:$4 sm:$0xff]   ;;  %v4068_v58 = vld [vmem:[%s5626_s3 + $0x1c4] ss:$16 sps:$4 sm:$0xff]  }
 0x17a   : > { %2195 = vmatmul.mubr.bf16.gmra.mrb[20].mxu1 %v4025_v18  ;;  %v1431_v0 = vadd.f32 %v3895_v5, %v5641_v38  ;;  %v1422_v14 = vpop.f32.mrb[59].mxu0  ;;  %3645 = vmatpush3.bf16.msra.mxu0 %v5091_v60  ;;  %v1508_v12 = vmax.f32 %v1428_v19, 0.0  ;;  %v4070_v28 = vld [vmem:[%s5626_s3 + $0xcc] ss:$16 sps:$4 sm:$0xff]   ;;  %v4072_v18 = vld [vmem:[%s5626_s3 + $0x1c0] ss:$16 sps:$4 sm:$0xff]  }
 0x17b   : > { %2202 = vmatprep.mubr.bf16.mxu1 %v4026_v36  ;;  %v1423_v8 = vadd.f32 %v1422_v14, %v5642_v13  ;;  %3646 = vmatprep.subr.bf16.mxu0 %v1541_v35  ;;  %v1506_v52 = vmax.f32 %v1420_v37, 0.0  ;;  %v4073_v35 = vld [vmem:[%s5626_s3 + $0xc8] ss:$16 sps:$4 sm:$0xff]   ;;  %v4074_v36 = vld [vmem:[%s5626_s3 + $0x1e4] ss:$16 sps:$4 sm:$0xff]  }
 0x17c   : > { %v1509_v31 = vmax.f32 %v1431_v0, 0.0  ;;  %v4076_v7 = vld [vmem:[%s5626_s3 + $0xec] ss:$16 sps:$4 sm:$0xff]   ;;  %v4078_v49 = vld [vmem:[%s5626_s3 + $0x1e0] ss:$16 sps:$4 sm:$0xff]  }
 0x17d   : > { %v1507_v53 = vmax.f32 %v1423_v8, 0.0  ;;  %v4079_v19 = vld [vmem:[%s5626_s3 + $0xe8] ss:$16 sps:$4 sm:$0xff]   ;;  %v4080_v25 = vld [vmem:[%s5626_s3 + $0x10c] ss:$16 sps:$4 sm:$0xff]  }
 0x17e   : > { %v1543_v29 = vpack.c.bf16 %v1509_v31, %v1508_v12  ;;  %3647 = vmatpush3.bf16.msra.mxu0 %v5086_v39  ;;  %v5644_v39 = vld [vmem:[#allocation10_spill] sm:$0xff] }
 0x17f   : > { %v1542_v60 = vpack.c.bf16 %v1507_v53, %v1506_v52  ;;  %v3898_v33 = vpop.f32.mrb[60].mxu0  ;;  %v4082_v37 = vld [vmem:[%s5626_s3 + $0x108] ss:$16 sps:$4 sm:$0xff]   ;;  %v4083_v5 = vld [vmem:[%s5626_s3 + $0x12c] ss:$16 sps:$4 sm:$0xff]  }
 0x180   : > { %v1444_v56 = vadd.f32 %v3898_v33, %v5094_v27  ;;  %v1435_v22 = vpop.f32.mrb[61].mxu0  ;;  %v4031_v27 = vld [vmem:[%s5626_s3 + $0xe0] ss:$16 sps:$4 sm:$0xff]   ;;  %v4085_v38 = vld [vmem:[%s5626_s3 + $0x128] ss:$16 sps:$4 sm:$0xff]  }
 0x181   : > { %v1436_v59 = vadd.f32 %v1435_v22, %v5643_v1  ;;  %v3899_v6 = vpop.f32.mrb[62].mxu0  ;;  %3648 = vmatprep.subr.bf16.mxu0 %v1542_v60  ;;  %v4086_v0 = vld [vmem:[%s5626_s3 + $0x14c] ss:$16 sps:$4 sm:$0xff]   ;;  %v4088_v14 = vld [vmem:[%s5626_s3 + $0x148] ss:$16 sps:$4 sm:$0xff]  }
 0x182   : > { %2203 = vmatmul.mubr.bf16.gmra.mrb[24].mxu1 %v4028_v61  ;;  %v1447_v57 = vadd.f32 %v3899_v6, %v5098_v42  ;;  %v1438_v44 = vpop.f32.mrb[63].mxu0  ;;  %3649 = vmatpush3.bf16.msra.mxu0 %v5109_v11  ;;  %v1512_v32 = vmax.f32 %v1444_v56, 0.0  ;;  %v4032_v42 = vld [vmem:[%s5626_s3 + $0x104] ss:$16 sps:$4 sm:$0xff]   ;;  %v4089_v13 = vld [vmem:[%s5626_s3 + $0x16c] ss:$16 sps:$4 sm:$0xff]  }
 0x183   : > { %2210 = vmatprep.mubr.bf16.mxu1 %v4029_v41  ;;  %v1439_v46 = vadd.f32 %v1438_v44, %v5644_v39  ;;  %3650 = vmatprep.subr.bf16.mxu0 %v1543_v29  ;;  %v1510_v45 = vmax.f32 %v1436_v59, 0.0  ;;  %v4091_v8 = vld [vmem:[%s5626_s3 + $0x168] ss:$16 sps:$4 sm:$0xff]   ;;  %v4092_v12 = vld [vmem:[%s5626_s3 + $0x18c] ss:$16 sps:$4 sm:$0xff]  }
 0x184   : > { %v1513_v63 = vmax.f32 %v1447_v57, 0.0  ;;  %v4094_v31 = vld [vmem:[%s5626_s3 + $0x188] ss:$16 sps:$4 sm:$0xff]   ;;  %v4095_v52 = vld [vmem:[%s5626_s3 + $0x1ac] ss:$16 sps:$4 sm:$0xff]  }
 0x185   : > { %v1511_v62 = vmax.f32 %v1439_v46, 0.0  ;;  %v4097_v53 = vld [vmem:[%s5626_s3 + $0x1a8] ss:$16 sps:$4 sm:$0xff]   ;;  %v4098_v61 = vld [vmem:[%s5626_s3 + $0x1cc] ss:$16 sps:$4 sm:$0xff]  }
 0x186   : > { %v1545_v20 = vpack.c.bf16 %v1513_v63, %v1512_v32  ;;  %3651 = vmatpush3.bf16.msra.mxu0 %v5104_v9  ;;  %v4038_v9 = vld [vmem:[%s5626_s3 + $0x124] ss:$16 sps:$4 sm:$0xff]   ;;  %v4100_v29 = vld [vmem:[%s5626_s3 + $0x1c8] ss:$16 sps:$4 sm:$0xff]   ;;  %v4101_v41 = vld [vmem:[%s5626_s3 + $0x1ec] ss:$16 sps:$4 sm:$0xff]  }
 0x187   : > { %v1544_v11 = vpack.c.bf16 %v1511_v62, %v1510_v45  ;;  %v4103_v60 = vld [vmem:[%s5626_s3 + $0x1e8] ss:$16 sps:$4 sm:$0xff]   ;;  %v5317_v45 = vpop.permute.xlu0 %1724  ;;  %v5319_v62 = vpop.permute.xlu1 %1729 }
 0x189   : > { %3652 = vmatprep.subr.bf16.mxu0 %v1544_v11 }
 0x18a   : > { %2211 = vmatmul.mubr.bf16.gmra.mrb[28].mxu1 %v4031_v27  ;;  %3653 = vmatpush3.bf16.msra.mxu0 %v5121_v55  ;;  %v4040_v55 = vld [vmem:[%s5626_s3 + $0x2c] ss:$16 sps:$4 sm:$0xff]  }
 0x18b   : > { %2218 = vmatprep.mubr.bf16.mxu1 %v4032_v42  ;;  %3654 = vmatprep.subr.bf16.mxu0 %v1545_v20 }
 0x18e   : > { %3655 = vmatpush3.bf16.msra.mxu0 %v5116_v54  ;;  %v4043_v54 = vld [vmem:[%s5626_s3 + $0x28] ss:$16 sps:$4 sm:$0xff]  }
 0x191   : > { %2316 = vmatmul.mubr.bf16.vlgmr.msra.gmra.mrb[64].mxu0 %v4034_v26 }
 0x192   : > { %2219 = vmatmul.mubr.bf16.gmra.mrb[32].mxu1 %v4037_v16  ;;  %2323 = vmatprep.mubr.bf16.mxu0 %v4040_v55  ;;  %v1645_v16 = vpop.permute.xlu0 %1644  ;;  %v1650_v55 = vpop.permute.xlu1 %1649 }
 0x193   : > { %2226 = vmatprep.mubr.bf16.mxu1 %v4038_v9 }
 0x199   : > { %2324 = vmatmul.mubr.bf16.gmra.mrb[68].mxu0 %v4043_v54 }
 0x19a   : > { %2227 = vmatmul.mubr.bf16.gmra.mrb[36].mxu1 %v4042_v34  ;;  %2331 = vmatprep.mubr.bf16.mxu0 %v4046_v48 }
 0x19b   : > { %2234 = vmatprep.mubr.bf16.mxu1 %v4044_v15  ;;  %v5325_v15 = vpop.permute.xlu0 %1734 }
 0x1a1   : > { %2332 = vmatmul.mubr.bf16.gmra.mrb[72].mxu0 %v4049_v2  ;;  %v5329_v2 = vpop.permute.xlu1 %1739 }
 0x1a2   : > { %2235 = vmatmul.mubr.bf16.gmra.mrb[40].mxu1 %v4048_v4  ;;  %2339 = vmatprep.mubr.bf16.mxu0 %v4052_v23 }
 0x1a3   : > { %2242 = vmatprep.mubr.bf16.mxu1 %v4050_v50 }
 0x1a9   : > { %2340 = vmatmul.mubr.bf16.gmra.mrb[76].mxu0 %v4055_v3 }
 0x1aa   : > { %2243 = vmatmul.mubr.bf16.gmra.mrb[44].mxu1 %v4054_v40  ;;  %2347 = vmatprep.mubr.bf16.mxu0 %v4058_v51  ;;  %v1655_v40 = vpop.permute.xlu0 %1654 }
 0x1ab   : > { %2250 = vmatprep.mubr.bf16.mxu1 %v4056_v21  ;;  %v5333_v21 = vpop.permute.xlu1 %1659 }
 0x1b1   : > { %2348 = vmatmul.mubr.bf16.gmra.mrb[80].mxu0 %v4061_v30 }
 0x1b2   : > { %2251 = vmatmul.mubr.bf16.gmra.mrb[48].mxu1 %v4060_v24  ;;  %2355 = vmatprep.mubr.bf16.mxu0 %v4064_v43 }
 0x1b3   : > { %2258 = vmatprep.mubr.bf16.mxu1 %v4062_v17 }
 0x1b9   : > { %2356 = vmatmul.mubr.bf16.gmra.mrb[84].mxu0 %v4067_v47  ;;  %v5341_v47 = vpop.permute.xlu1 %1749 }
 0x1ba   : > { %2259 = vmatmul.mubr.bf16.gmra.mrb[52].mxu1 %v4066_v10  ;;  %2363 = vmatprep.mubr.bf16.mxu0 %v4070_v28  ;;  %v5339_v10 = vpop.permute.xlu0 %1744 }
 0x1bb   : > { %2266 = vmatprep.mubr.bf16.mxu1 %v4068_v58 }
 0x1c1   : > { %2364 = vmatmul.mubr.bf16.gmra.mrb[88].mxu0 %v4073_v35 }
 0x1c2   : > { %2267 = vmatmul.mubr.bf16.gmra.mrb[56].mxu1 %v4072_v18  ;;  %2371 = vmatprep.mubr.bf16.mxu0 %v4076_v7  ;;  %v5345_v7 = vpop.permute.xlu0 %1664 }
 0x1c3   : > { %2274 = vmatprep.mubr.bf16.mxu1 %v4074_v36 }
 0x1c9   : > { %2372 = vmatmul.mubr.bf16.gmra.mrb[92].mxu0 %v4079_v19  ;;  %v5349_v19 = vpop.permute.xlu1 %1669 }
 0x1ca   : > { %2275 = vmatmul.mubr.bf16.gmra.mrb[60].mxu1 %v4078_v49  ;;  %2379 = vmatprep.mubr.bf16.mxu0 %v4080_v25 }
 0x1d1   : > { %2380 = vmatmul.mubr.bf16.gmra.mrb[96].mxu0 %v4082_v37 }
 0x1d2   : > { %2387 = vmatprep.mubr.bf16.mxu0 %v4083_v5  ;;  %v5351_v5 = vpop.permute.xlu0 %1754 }
 0x1d9   : > { %2388 = vmatmul.mubr.bf16.gmra.mrb[100].mxu0 %v4085_v38 }
 0x1da   : > { %2395 = vmatprep.mubr.bf16.mxu0 %v4086_v0 }
 0x1e1   : > { %2396 = vmatmul.mubr.bf16.gmra.mrb[104].mxu0 %v4088_v14  ;;  %v5355_v14 = vpop.permute.xlu1 %1759 }
 0x1e2   : > { %2403 = vmatprep.mubr.bf16.mxu0 %v4089_v13 }
 0x1e9   : > { %2404 = vmatmul.mubr.bf16.gmra.mrb[108].mxu0 %v4091_v8 }
 0x1ea   : > { %2411 = vmatprep.mubr.bf16.mxu0 %v4092_v12  ;;  %v5359_v12 = vpop.permute.xlu0 %1674 }
 0x1f1   : > { %2412 = vmatmul.mubr.bf16.gmra.mrb[112].mxu0 %v4094_v31 }
 0x1f2   : > { %2419 = vmatprep.mubr.bf16.mxu0 %v4095_v52  ;;  %v5361_v52 = vpop.permute.xlu1 %1679 }
 0x1f9   : > { %2420 = vmatmul.mubr.bf16.gmra.mrb[116].mxu0 %v4097_v53 }
 0x1fa   : > { %2427 = vmatprep.mubr.bf16.mxu0 %v4098_v61 }
 0x201   : > { %2428 = vmatmul.mubr.bf16.gmra.mrb[120].mxu0 %v4100_v29 }
 0x202   : > { %2435 = vmatprep.mubr.bf16.mxu0 %v4101_v41 }
 0x209   : > { %2436 = vmatmul.mubr.bf16.gmra.mrb[124].mxu0 %v4103_v60 }
 0x225   : > { %v3544_v33 = vpop.f32.mrb[0].mxu1 }
 0x226   : > { %v3545_v56 = vpop.f32.mrb[1].mxu1 }
 0x227   : > { %v5309_v22 = vadd.f32 %v3545_v56, %v3544_v33  ;;  %v3547_v1 = vpop.f32.mrb[2].mxu1  ;;  %v5367_v33 = vpop.permute.xlu0 %1764 }
 0x228   : > { %v3548_v59 = vpop.f32.mrb[3].mxu1  ;;  %v5369_v56 = vpop.permute.xlu1 %1769 }
 0x229   : > { %v5311_v6 = vadd.f32 %v3548_v59, %v3547_v1 }
 0x22d   : > { %v3550_v57 = vpop.f32.mrb[4].mxu1 }
 0x22e   : > { %v3551_v44 = vpop.f32.mrb[5].mxu1 }
 0x22f   : > { %v5313_v39 = vadd.f32 %v3551_v44, %v3550_v57  ;;  %v3553_v46 = vpop.f32.mrb[6].mxu1 }
 0x230   : > { %v3554_v32 = vpop.f32.mrb[7].mxu1 }
 0x231   : > { %v5315_v63 = vadd.f32 %v3554_v32, %v3553_v46  ;;  %v2157_v46 = vadd.f32 %v5309_v22, %v1645_v16  ;;  %v5382_v22 = vpop.permute.xlu1 %1689 }
 0x235   : > { %v3556_v27 = vpop.f32.mrb[8].mxu1 }
 0x236   : > { %v3557_v20 = vpop.f32.mrb[9].mxu1 }
 0x237   : > { %v5321_v42 = vadd.f32 %v3557_v20, %v3556_v27  ;;  %v3559_v11 = vpop.f32.mrb[10].mxu1 }
 0x238   : > { %v3560_v26 = vpop.f32.mrb[11].mxu1 }
 0x239   : > { %v5323_v9 = vadd.f32 %v3560_v26, %v3559_v11 }
 0x23d   : > { %v3562_v34 = vpop.f32.mrb[12].mxu1 }
 0x23e   : > { %v3563_v54 = vpop.f32.mrb[13].mxu1 }
 0x23f   : > { %v5327_v48 = vadd.f32 %v3563_v54, %v3562_v34  ;;  %v3565_v4 = vpop.f32.mrb[14].mxu1  ;;  %v2160_v54 = vadd.f32 %v5311_v6, %v1650_v55  ;;  %v2165_v55 = vadd.f32 %v5313_v39, %v1655_v40  ;;  %v5395_v39 = vpop.permute.xlu1 %1779 }
 0x240   : > { %v3566_v50 = vpop.f32.mrb[15].mxu1 }
 0x241   : > { %v5331_v23 = vadd.f32 %v3566_v50, %v3565_v4 }
 0x245   : > { %v3568_v3 = vpop.f32.mrb[16].mxu1 }
 0x246   : > { %v3569_v51 = vpop.f32.mrb[17].mxu1 }
 0x247   : > { %v5335_v24 = vadd.f32 %v3569_v51, %v3568_v3  ;;  %v3571_v30 = vpop.f32.mrb[18].mxu1  ;;  %v4106_v51 = vld [vmem:[%s5628_s5 + $0x4] ss:$8 sps:$4 sm:$0xff]  }
 0x248   : > { %v3572_v17 = vpop.f32.mrb[19].mxu1  ;;  %2716 = vmatprep.mubr.bf16.mxu1 %v4106_v51 }
 0x249   : > { %v5337_v43 = vadd.f32 %v3572_v17, %v3571_v30  ;;  %v5380_v17 = vpop.permute.xlu0 %1684 }
 0x24d   : > { %v3574_v58 = vpop.f32.mrb[20].mxu1 }
 0x24e   : > { %v3575_v28 = vpop.f32.mrb[21].mxu1 }
 0x24f   : > { %v5343_v18 = vadd.f32 %v3575_v28, %v3574_v58  ;;  %v3577_v35 = vpop.f32.mrb[22].mxu1 }
 0x250   : > { %v3578_v36 = vpop.f32.mrb[23].mxu1 }
 0x251   : > { %v5347_v49 = vadd.f32 %v3578_v36, %v3577_v35 }
 0x255   : > { %v3580_v25 = vpop.f32.mrb[24].mxu1 }
 0x256   : > { %v3581_v37 = vpop.f32.mrb[25].mxu1 }
 0x257   : > { %v5353_v38 = vadd.f32 %v3581_v37, %v3580_v25  ;;  %v3583_v0 = vpop.f32.mrb[26].mxu1 }
 0x258   : > { %v3584_v13 = vpop.f32.mrb[27].mxu1 }
 0x259   : > { %v5357_v8 = vadd.f32 %v3584_v13, %v3583_v0 }
 0x25d   : > { %v3586_v31 = vpop.f32.mrb[28].mxu1 }
 0x25e   : > { %v3587_v53 = vpop.f32.mrb[29].mxu1 }
 0x25f   : > { %v5363_v61 = vadd.f32 %v3587_v53, %v3586_v31  ;;  %v3589_v29 = vpop.f32.mrb[30].mxu1 }
 0x260   : > { %v3590_v41 = vpop.f32.mrb[31].mxu1 }
 0x261   : > { %v5365_v60 = vadd.f32 %v3590_v41, %v3589_v29  ;;  %v2168_v41 = vadd.f32 %v5315_v63, %v5333_v21 }
 0x264   : > { %v3656_v59 = vpop.f32.mrb[64].mxu0 }
 0x265   : > { %v3592_v1 = vpop.f32.mrb[32].mxu1  ;;  %v3657_v44 = vpop.f32.mrb[65].mxu0 }
 0x266   : > { %v3593_v57 = vpop.f32.mrb[33].mxu1  ;;  %v3658_v27 = vadd.f32 %v3657_v44, %v3656_v59  ;;  %v3659_v11 = vpop.f32.mrb[66].mxu0 }
 0x267   : > { %v5372_v32 = vadd.f32 %v3593_v57, %v3592_v1  ;;  %v3595_v20 = vpop.f32.mrb[34].mxu1  ;;  %v3660_v34 = vpop.f32.mrb[67].mxu0 }
 0x268   : > { %v3596_v26 = vpop.f32.mrb[35].mxu1  ;;  %v2318_v4 = vadd.f32 %v3658_v27, %v2157_v46  ;;  %v3661_v3 = vadd.f32 %v3660_v34, %v3659_v11  ;;  %v5393_v46 = vpop.permute.xlu0 %1774 }
 0x269   : > { %v5375_v50 = vadd.f32 %v3596_v26, %v3595_v20 }
 0x26a   : > { %v2321_v30 = vadd.f32 %v3661_v3, %v2160_v54  ;;  %v2444_v16 = vmax.f32 %v2318_v4, 0.0  ;;  %v2173_v54 = vadd.f32 %v5321_v42, %v5345_v7 }
 0x26c   : > { %v2445_v58 = vmax.f32 %v2321_v30, 0.0  ;;  %v3662_v35 = vpop.f32.mrb[68].mxu0 }
 0x26d   : > { %v3598_v28 = vpop.f32.mrb[36].mxu1  ;;  %v3663_v6 = vpop.f32.mrb[69].mxu0 }
 0x26e   : > { %v3599_v36 = vpop.f32.mrb[37].mxu1  ;;  %v5385_v25 = vpack.c.bf16 %v2445_v58, %v2444_v16  ;;  %v3664_v0 = vadd.f32 %v3663_v6, %v3662_v35  ;;  %v3665_v31 = vpop.f32.mrb[70].mxu0  ;;  %v2176_v58 = vadd.f32 %v5323_v9, %v5349_v19 }
 0x26f   : > { %v5387_v37 = vadd.f32 %v3599_v36, %v3598_v28  ;;  %v3601_v13 = vpop.f32.mrb[38].mxu1  ;;  %v3666_v29 = vpop.f32.mrb[71].mxu0 }
 0x270   : > { %v3602_v53 = vpop.f32.mrb[39].mxu1  ;;  %v2326_v1 = vadd.f32 %v3664_v0, %v2165_v55  ;;  %v3667_v57 = vadd.f32 %v3666_v29, %v3665_v31  ;;  %v1695_v55 = vpop.permute.xlu0 %1694 }
 0x271   : > { %v5391_v59 = vadd.f32 %v3602_v53, %v3601_v13  ;;  %v1700_v0 = vpop.permute.xlu1 %1699 }
 0x272   : > { %v2329_v44 = vadd.f32 %v3667_v57, %v2168_v41  ;;  %v2446_v40 = vmax.f32 %v2326_v1, 0.0  ;;  %v2181_v41 = vadd.f32 %v5327_v48, %v5359_v12 }
 0x274   : > { %v2447_v27 = vmax.f32 %v2329_v44, 0.0  ;;  %v3668_v11 = vpop.f32.mrb[72].mxu0 }
 0x275   : > { %v3604_v20 = vpop.f32.mrb[40].mxu1  ;;  %v3669_v34 = vpop.f32.mrb[73].mxu0 }
 0x276   : > { %v3605_v26 = vpop.f32.mrb[41].mxu1  ;;  %v5399_v4 = vpack.c.bf16 %v2447_v27, %v2446_v40  ;;  %v3670_v21 = vadd.f32 %v3669_v34, %v3668_v11  ;;  %v3671_v51 = vpop.f32.mrb[74].mxu0 }
 0x277   : > { %v5401_v63 = vadd.f32 %v3605_v26, %v3604_v20  ;;  %v3607_v3 = vpop.f32.mrb[42].mxu1  ;;  %v3672_v16 = vpop.f32.mrb[75].mxu0  ;;  %v2184_v20 = vadd.f32 %v5331_v23, %v5361_v52 }
 0x278   : > { %v3608_v30 = vpop.f32.mrb[43].mxu1  ;;  %v2334_v28 = vadd.f32 %v3670_v21, %v2173_v54  ;;  %v3673_v36 = vadd.f32 %v3672_v16, %v3671_v51  ;;  %v5417_v21 = vpop.permute.xlu0 %1784 }
 0x279   : > { %v5405_v35 = vadd.f32 %v3608_v30, %v3607_v3  ;;  %v5419_v48 = vpop.permute.xlu1 %1789 }
 0x27a   : > { %v2337_v6 = vadd.f32 %v3673_v36, %v2176_v58  ;;  %v2448_v42 = vmax.f32 %v2334_v28, 0.0  ;;  %v2189_v28 = vadd.f32 %v5335_v24, %v5380_v17 }
 0x27c   : > { %v2449_v7 = vmax.f32 %v2337_v6, 0.0  ;;  %v3674_v31 = vpop.f32.mrb[76].mxu0 }
 0x27d   : > { %v3610_v13 = vpop.f32.mrb[44].mxu1  ;;  %v3675_v29 = vpop.f32.mrb[77].mxu0 }
 0x27e   : > { %v3611_v53 = vpop.f32.mrb[45].mxu1  ;;  %v5409_v1 = vpack.c.bf16 %v2449_v7, %v2448_v42  ;;  %v3676_v9 = vadd.f32 %v3675_v29, %v3674_v31  ;;  %v3677_v44 = vpop.f32.mrb[78].mxu0  ;;  %v2192_v31 = vadd.f32 %v5337_v43, %v5382_v22 }
 0x27f   : > { %v5411_v57 = vadd.f32 %v3611_v53, %v3610_v13  ;;  %v3613_v19 = vpop.f32.mrb[46].mxu1  ;;  %v3678_v27 = vpop.f32.mrb[79].mxu0 }
 0x280   : > { %v3614_v40 = vpop.f32.mrb[47].mxu1  ;;  %v2342_v11 = vadd.f32 %v3676_v9, %v2181_v41  ;;  %v3679_v34 = vadd.f32 %v3678_v27, %v3677_v44  ;;  %v1710_v44 = vpop.permute.xlu1 %1709 }
 0x281   : > { %v5415_v26 = vadd.f32 %v3614_v40, %v3613_v19  ;;  %v1705_v19 = vpop.permute.xlu0 %1704 }
 0x282   : > { %v2345_v54 = vadd.f32 %v3679_v34, %v2184_v20  ;;  %v2450_v12 = vmax.f32 %v2342_v11, 0.0  ;;  %v2197_v34 = vadd.f32 %v5343_v18, %v1695_v55 }
 0x284   : > { %v2451_v3 = vmax.f32 %v2345_v54, 0.0  ;;  %v3680_v30 = vpop.f32.mrb[80].mxu0 }
 0x285   : > { %v3616_v51 = vpop.f32.mrb[48].mxu1  ;;  %v3681_v58 = vpop.f32.mrb[81].mxu0 }
 0x286   : > { %v3617_v16 = vpop.f32.mrb[49].mxu1  ;;  %v5423_v36 = vpack.c.bf16 %v2451_v3, %v2450_v12  ;;  %v3682_v52 = vadd.f32 %v3681_v58, %v3680_v30  ;;  %v3683_v42 = vpop.f32.mrb[82].mxu0 }
 0x287   : > { %v5425_v23 = vadd.f32 %v3617_v16, %v3616_v51  ;;  %v3619_v6 = vpop.f32.mrb[50].mxu1  ;;  %v3684_v13 = vpop.f32.mrb[83].mxu0  ;;  %v2200_v16 = vadd.f32 %v5347_v49, %v1700_v0 }
 0x288   : > { %v3620_v7 = vpop.f32.mrb[51].mxu1  ;;  %v2350_v53 = vadd.f32 %v3682_v52, %v2189_v28  ;;  %v3685_v41 = vadd.f32 %v3684_v13, %v3683_v42  ;;  %v5439_v42 = vpop.permute.xlu0 %1794 }
 0x289   : > { %v5429_v29 = vadd.f32 %v3620_v7, %v3619_v6  ;;  %v5441_v7 = vpop.permute.xlu1 %1799 }
 0x28a   : > { %v2353_v9 = vadd.f32 %v3685_v41, %v2192_v31  ;;  %v2452_v24 = vmax.f32 %v2350_v53, 0.0 }
 0x28c   : > { %v2453_v17 = vmax.f32 %v2353_v9, 0.0  ;;  %v3686_v27 = vpop.f32.mrb[84].mxu0  ;;  %v2205_v9 = vadd.f32 %v5353_v38, %v1705_v19 }
 0x28d   : > { %v3622_v40 = vpop.f32.mrb[52].mxu1  ;;  %v3687_v11 = vpop.f32.mrb[85].mxu0 }
 0x28e   : > { %v3623_v20 = vpop.f32.mrb[53].mxu1  ;;  %v5432_v54 = vpack.c.bf16 %v2453_v17, %v2452_v24  ;;  %v3688_v43 = vadd.f32 %v3687_v11, %v3686_v27  ;;  %v3689_v3 = vpop.f32.mrb[86].mxu0  ;;  %v2208_v11 = vadd.f32 %v5357_v8, %v1710_v44 }
 0x28f   : > { %v5434_v12 = vadd.f32 %v3623_v20, %v3622_v40  ;;  %v3625_v22 = vpop.f32.mrb[54].mxu1  ;;  %v3690_v30 = vpop.f32.mrb[87].mxu0 }
 0x290   : > { %v3626_v51 = vpop.f32.mrb[55].mxu1  ;;  %v2358_v58 = vadd.f32 %v3688_v43, %v2197_v34  ;;  %v3691_v52 = vadd.f32 %v3690_v30, %v3689_v3  ;;  %v1720_v30 = vpop.permute.xlu1 %1719 }
 0x291   : > { %v5437_v28 = vadd.f32 %v3626_v51, %v3625_v22  ;;  %v1715_v51 = vpop.permute.xlu0 %1714 }
 0x292   : > { %v2361_v6 = vadd.f32 %v3691_v52, %v2200_v16  ;;  %v2454_v18 = vmax.f32 %v2358_v58, 0.0 }
 0x294   : > { %v2455_v55 = vmax.f32 %v2361_v6, 0.0  ;;  %v3692_v31 = vpop.f32.mrb[88].mxu0 }
 0x295   : > { %v3628_v13 = vpop.f32.mrb[56].mxu1  ;;  %v3693_v41 = vpop.f32.mrb[89].mxu0 }
 0x296   : > { %v3629_v53 = vpop.f32.mrb[57].mxu1  ;;  %v5444_v24 = vpack.c.bf16 %v2455_v55, %v2454_v18  ;;  %v3694_v0 = vadd.f32 %v3693_v41, %v3692_v31  ;;  %v3695_v40 = vpop.f32.mrb[90].mxu0  ;;  %v2213_v18 = vadd.f32 %v5363_v61, %v1715_v51 }
 0x297   : > { %v5446_v49 = vadd.f32 %v3629_v53, %v3628_v13  ;;  %v3631_v17 = vpop.f32.mrb[58].mxu1  ;;  %v3696_v20 = vpop.f32.mrb[91].mxu0 }
 0x298   : > { %v3632_v27 = vpop.f32.mrb[59].mxu1  ;;  %v2366_v34 = vadd.f32 %v3694_v0, %v2205_v9  ;;  %v3697_v22 = vadd.f32 %v3696_v20, %v3695_v40  ;;  %v2216_v9 = vadd.f32 %v5365_v60, %v1720_v30  ;;  %v2224_v60 = vadd.f32 %v5375_v50, %v5319_v62 }
 0x299   : > { %v5449_v43 = vadd.f32 %v3632_v27, %v3631_v17 }
 0x29a   : > { %v2369_v3 = vadd.f32 %v3697_v22, %v2208_v11  ;;  %v2456_v16 = vmax.f32 %v2366_v34, 0.0  ;;  %v2221_v22 = vadd.f32 %v5372_v32, %v5317_v45 }
 0x29c   : > { %v2457_v38 = vmax.f32 %v2369_v3, 0.0  ;;  %v3698_v58 = vpop.f32.mrb[92].mxu0 }
 0x29d   : > { %v3634_v19 = vpop.f32.mrb[60].mxu1  ;;  %v3699_v6 = vpop.f32.mrb[93].mxu0 }
 0x29e   : > { %v3635_v52 = vpop.f32.mrb[61].mxu1  ;;  %v5452_v55 = vpack.c.bf16 %v2457_v38, %v2456_v16  ;;  %v3700_v8 = vadd.f32 %v3699_v6, %v3698_v58  ;;  %v3701_v31 = vpop.f32.mrb[94].mxu0 }
 0x29f   : > { %v5454_v13 = vadd.f32 %v3635_v52, %v3634_v19  ;;  %v3637_v44 = vpop.f32.mrb[62].mxu1  ;;  %v3702_v41 = vpop.f32.mrb[95].mxu0 }
 0x2a0   : > { %v3638_v53 = vpop.f32.mrb[63].mxu1  ;;  %v2374_v0 = vadd.f32 %v3700_v8, %v2213_v18  ;;  %v3703_v40 = vadd.f32 %v3702_v41, %v3701_v31  ;;  %v2232_v41 = vadd.f32 %v5391_v59, %v5329_v2  ;;  %v2240_v2 = vadd.f32 %v5405_v35, %v5341_v47 }
 0x2a1   : > { %v5457_v17 = vadd.f32 %v3638_v53, %v3637_v44  ;;  %v2229_v44 = vadd.f32 %v5387_v37, %v5325_v15  ;;  %v2237_v15 = vadd.f32 %v5401_v63, %v5339_v10  ;;  %v2245_v10 = vadd.f32 %v5411_v57, %v5351_v5 }
 0x2a2   : > { %v2377_v27 = vadd.f32 %v3703_v40, %v2216_v9  ;;  %v2458_v20 = vmax.f32 %v2374_v0, 0.0  ;;  %v2248_v47 = vadd.f32 %v5415_v26, %v5355_v14  ;;  %v2253_v5 = vadd.f32 %v5425_v23, %v5367_v33 }
 0x2a3   : > { %v2256_v14 = vadd.f32 %v5429_v29, %v5369_v56  ;;  %v2261_v33 = vadd.f32 %v5434_v12, %v5393_v46  ;;  %v2264_v56 = vadd.f32 %v5437_v28, %v5395_v39  ;;  %v2269_v46 = vadd.f32 %v5446_v49, %v5417_v21 }
 0x2a4   : > { %v2459_v11 = vmax.f32 %v2377_v27, 0.0  ;;  %v3704_v34 = vpop.f32.mrb[96].mxu0  ;;  %v2272_v39 = vadd.f32 %v5449_v43, %v5419_v48  ;;  %v2277_v21 = vadd.f32 %v5454_v13, %v5439_v42  ;;  %v2280_v48 = vadd.f32 %v5457_v17, %v5441_v7  ;;  %v4104_v42 = vld [vmem:[%s5628_s5] ss:$8 sps:$4 sm:$0xff]   ;;  %v4107_v7 = vld [vmem:[%s5628_s5 + $0x14] ss:$8 sps:$4 sm:$0xff]  }
 0x2a5   : > { %v3705_v61 = vpop.f32.mrb[97].mxu0  ;;  %v4110_v13 = vld [vmem:[%s5628_s5 + $0x24] ss:$8 sps:$4 sm:$0xff]   ;;  %v4112_v17 = vld [vmem:[%s5628_s5 + $0x20] ss:$8 sps:$4 sm:$0xff]  }
 0x2a6   : > { %v5461_v3 = vpack.c.bf16 %v2459_v11, %v2458_v20  ;;  %v3706_v51 = vadd.f32 %v3705_v61, %v3704_v34  ;;  %v3707_v16 = vpop.f32.mrb[98].mxu0 }
 0x2a7   : > { %v3708_v38 = vpop.f32.mrb[99].mxu0 }
 0x2a8   : > { %v2382_v30 = vadd.f32 %v3706_v51, %v2221_v22  ;;  %v3709_v19 = vadd.f32 %v3708_v38, %v3707_v16 }
 0x2aa   : > { %v2385_v58 = vadd.f32 %v3709_v19, %v2224_v60  ;;  %v2460_v52 = vmax.f32 %v2382_v30, 0.0 }
 0x2ac   : > { %v2461_v6 = vmax.f32 %v2385_v58, 0.0  ;;  %v3710_v18 = vpop.f32.mrb[100].mxu0 }
 0x2ad   : > { %v3711_v8 = vpop.f32.mrb[101].mxu0 }
 0x2ae   : > { %v3712_v31 = vadd.f32 %v3711_v8, %v3710_v18  ;;  %v3713_v45 = vpop.f32.mrb[102].mxu0  ;;  %v2484_v32 = vpack.c.bf16 %v2461_v6, %v2460_v52 }
 0x2af   : > { %v3714_v53 = vpop.f32.mrb[103].mxu0 }
 0x2b0   : > { %v2390_v9 = vadd.f32 %v3712_v31, %v2229_v44  ;;  %v3715_v0 = vadd.f32 %v3714_v53, %v3713_v45  ;;  %3752 = vmatprep.subr.bf16.mxu1 %v2484_v32 }
 0x2b1   : > { %3753 = vmatpush3.bf16.msra.mxu1 %v5385_v25 }
 0x2b2   : > { %v2393_v62 = vadd.f32 %v3715_v0, %v2232_v41  ;;  %v2462_v50 = vmax.f32 %v2390_v9, 0.0 }
 0x2b4   : > { %v2463_v40 = vmax.f32 %v2393_v62, 0.0  ;;  %v3716_v27 = vpop.f32.mrb[104].mxu0 }
 0x2b5   : > { %v3717_v20 = vpop.f32.mrb[105].mxu0 }
 0x2b6   : > { %v3718_v37 = vadd.f32 %v3717_v20, %v3716_v27  ;;  %v3719_v11 = vpop.f32.mrb[106].mxu0  ;;  %v2485_v34 = vpack.c.bf16 %v2463_v40, %v2462_v50 }
 0x2b7   : > { %v3720_v61 = vpop.f32.mrb[107].mxu0 }
 0x2b8   : > { %v2398_v59 = vadd.f32 %v3718_v37, %v2237_v15  ;;  %v3721_v22 = vadd.f32 %v3720_v61, %v3719_v11  ;;  %3754 = vmatprep.subr.bf16.mxu1 %v2485_v34 }
 0x2b9   : > { %3755 = vmatpush3.bf16.msra.mxu1 %v5399_v4 }
 0x2ba   : > { %v2401_v25 = vadd.f32 %v3721_v22, %v2240_v2  ;;  %v2464_v51 = vmax.f32 %v2398_v59, 0.0 }
 0x2bc   : > { %v2465_v16 = vmax.f32 %v2401_v25, 0.0  ;;  %v3722_v38 = vpop.f32.mrb[108].mxu0 }
 0x2bd   : > { %v3723_v60 = vpop.f32.mrb[109].mxu0 }
 0x2be   : > { %v3724_v63 = vadd.f32 %v3723_v60, %v3722_v38  ;;  %v3725_v30 = vpop.f32.mrb[110].mxu0  ;;  %v2486_v19 = vpack.c.bf16 %v2465_v16, %v2464_v51 }
 0x2bf   : > { %v3726_v58 = vpop.f32.mrb[111].mxu0 }
 0x2c0   : > { %v2406_v35 = vadd.f32 %v3724_v63, %v2245_v10  ;;  %v3727_v52 = vadd.f32 %v3726_v58, %v3725_v30  ;;  %3756 = vmatprep.subr.bf16.mxu1 %v2486_v19 }
 0x2c1   : > { %3757 = vmatpush3.bf16.msra.mxu1 %v5409_v1 }
 0x2c2   : > { %v2409_v4 = vadd.f32 %v3727_v52, %v2248_v47  ;;  %v2466_v6 = vmax.f32 %v2406_v35, 0.0  ;;  %v4115_v35 = vld [vmem:[%s5628_s5 + $0x30] ss:$8 sps:$4 sm:$0xff]   ;;  %v4116_v52 = vld [vmem:[%s5628_s5 + $0x44] ss:$8 sps:$4 sm:$0xff]  }
 0x2c4   : > { %v2467_v18 = vmax.f32 %v2409_v4, 0.0  ;;  %v3728_v8 = vpop.f32.mrb[112].mxu0  ;;  %v4118_v4 = vld [vmem:[%s5628_s5 + $0x40] ss:$8 sps:$4 sm:$0xff]  }
 0x2c5   : > { %v3729_v44 = vpop.f32.mrb[113].mxu0 }
 0x2c6   : > { %v3730_v57 = vadd.f32 %v3729_v44, %v3728_v8  ;;  %v3731_v31 = vpop.f32.mrb[114].mxu0  ;;  %v2487_v45 = vpack.c.bf16 %v2467_v18, %v2466_v6  ;;  %v4119_v6 = vld [vmem:[%s5628_s5 + $0x54] ss:$8 sps:$4 sm:$0xff]   ;;  %v4121_v18 = vld [vmem:[%s5628_s5 + $0x50] ss:$8 sps:$4 sm:$0xff]  }
 0x2c7   : > { %v3732_v32 = vpop.f32.mrb[115].mxu0  ;;  %v4122_v8 = vld [vmem:[%s5628_s5 + $0x64] ss:$8 sps:$4 sm:$0xff]   ;;  %v4124_v44 = vld [vmem:[%s5628_s5 + $0x60] ss:$8 sps:$4 sm:$0xff]  }
 0x2c8   : > { %v2414_v26 = vadd.f32 %v3730_v57, %v2253_v5  ;;  %v3733_v53 = vadd.f32 %v3732_v32, %v3731_v31  ;;  %3758 = vmatprep.subr.bf16.mxu1 %v2487_v45  ;;  %v4125_v5 = vld [vmem:[%s5628_s5 + $0x74] ss:$8 sps:$4 sm:$0xff]   ;;  %v4127_v57 = vld [vmem:[%s5628_s5 + $0x70] ss:$8 sps:$4 sm:$0xff]   ;;  %v4128_v31 = vld [vmem:[%s5630_s7] sm:$0xff]  }
 0x2c9   : > { %3759 = vmatpush3.bf16.msra.mxu1 %v5423_v36 }
 0x2ca   : > { %v2417_v1 = vadd.f32 %v3733_v53, %v2256_v14  ;;  %v2468_v41 = vmax.f32 %v2414_v26, 0.0  ;;  %v2527_v53 = vpop.permute.xlu0 %2526 }
 0x2cc   : > { %v2469_v9 = vmax.f32 %v2417_v1, 0.0  ;;  %v3734_v0 = vpop.f32.mrb[116].mxu0 }
 0x2cd   : > { %v3735_v62 = vpop.f32.mrb[117].mxu0 }
 0x2ce   : > { %v3736_v23 = vadd.f32 %v3735_v62, %v3734_v0  ;;  %v3737_v50 = vpop.f32.mrb[118].mxu0  ;;  %v2488_v40 = vpack.c.bf16 %v2469_v9, %v2468_v41  ;;  %v2532_v0 = vpop.permute.xlu1 %2531 }
 0x2cf   : > { %v3738_v27 = vpop.f32.mrb[119].mxu0 }
 0x2d0   : > { %v2422_v29 = vadd.f32 %v3736_v23, %v2261_v33  ;;  %v3739_v20 = vadd.f32 %v3738_v27, %v3737_v50  ;;  %3760 = vmatprep.subr.bf16.mxu1 %v2488_v40 }
 0x2d1   : > { %3761 = vmatpush3.bf16.msra.mxu1 %v5432_v54 }
 0x2d2   : > { %v2425_v36 = vadd.f32 %v3739_v20, %v2264_v56  ;;  %v2470_v15 = vmax.f32 %v2422_v29, 0.0  ;;  %v2537_v20 = vpop.permute.xlu0 %2536 }
 0x2d4   : > { %v2471_v37 = vmax.f32 %v2425_v36, 0.0  ;;  %v3740_v11 = vpop.f32.mrb[120].mxu0 }
 0x2d5   : > { %v3741_v34 = vpop.f32.mrb[121].mxu0 }
 0x2d6   : > { %v3742_v12 = vadd.f32 %v3741_v34, %v3740_v11  ;;  %v3743_v61 = vpop.f32.mrb[122].mxu0  ;;  %v2489_v2 = vpack.c.bf16 %v2471_v37, %v2470_v15  ;;  %v2542_v11 = vpop.permute.xlu1 %2541 }
 0x2d7   : > { %v3744_v59 = vpop.f32.mrb[123].mxu0 }
 0x2d8   : > { %v2430_v28 = vadd.f32 %v3742_v12, %v2269_v46  ;;  %v3745_v22 = vadd.f32 %v3744_v59, %v3743_v61  ;;  %3762 = vmatprep.subr.bf16.mxu1 %v2489_v2 }
 0x2d9   : > { %3763 = vmatpush3.bf16.msra.mxu1 %v5444_v24 }
 0x2da   : > { %v2433_v54 = vadd.f32 %v3745_v22, %v2272_v39  ;;  %v2472_v25 = vmax.f32 %v2430_v28, 0.0  ;;  %v2547_v22 = vpop.permute.xlu0 %2546 }
 0x2dc   : > { %v2473_v51 = vmax.f32 %v2433_v54, 0.0  ;;  %v3746_v16 = vpop.f32.mrb[124].mxu0 }
 0x2dd   : > { %v3747_v38 = vpop.f32.mrb[125].mxu0 }
 0x2de   : > { %v3748_v49 = vadd.f32 %v3747_v38, %v3746_v16  ;;  %v3749_v60 = vpop.f32.mrb[126].mxu0  ;;  %v2490_v10 = vpack.c.bf16 %v2473_v51, %v2472_v25  ;;  %v2552_v16 = vpop.permute.xlu1 %2551 }
 0x2df   : > { %v3750_v63 = vpop.f32.mrb[127].mxu0 }
 0x2e0   : > { %v2438_v43 = vadd.f32 %v3748_v49, %v2277_v21  ;;  %v3751_v30 = vadd.f32 %v3750_v63, %v3749_v60  ;;  %3764 = vmatprep.subr.bf16.mxu1 %v2490_v10 }
 0x2e1   : > { %3765 = vmatpush3.bf16.msra.mxu1 %v5452_v55  ;;  %v4109_v55 = vld [vmem:[%s5628_s5 + $0x10] ss:$8 sps:$4 sm:$0xff]  }
 0x2e2   : > { %v2441_v24 = vadd.f32 %v3751_v30, %v2280_v48  ;;  %v2474_v19 = vmax.f32 %v2438_v43, 0.0  ;;  %v2557_v30 = vpop.permute.xlu0 %2556 }
 0x2e4   : > { %v2475_v58 = vmax.f32 %v2441_v24, 0.0 }
 0x2e6   : > { %v2491_v47 = vpack.c.bf16 %v2475_v58, %v2474_v19 }
 0x2e8   : > { %3766 = vmatprep.subr.bf16.mxu1 %v2491_v47  ;;  %v2562_v47 = vpop.permute.xlu1 %2561 }
 0x2e9   : > { %3767 = vmatpush3.bf16.msra.mxu1 %v5461_v3  ;;  %v4113_v3 = vld [vmem:[%s5628_s5 + $0x34] ss:$8 sps:$4 sm:$0xff]  }
 0x2ec   : > { %2717 = vmatmul.mubr.bf16.vlgmr.msra.gmra.mrb[64].mxu1 %v4104_v42 }
 0x2ed   : > { %2724 = vmatprep.mubr.bf16.mxu1 %v4107_v7 }
 0x2f4   : > { %2725 = vmatmul.mubr.bf16.gmra.mrb[68].mxu1 %v4109_v55 }
 0x2f5   : > { %2732 = vmatprep.mubr.bf16.mxu1 %v4110_v13 }
 0x2fc   : > { %2733 = vmatmul.mubr.bf16.gmra.mrb[72].mxu1 %v4112_v17 }
 0x2fd   : > { %2740 = vmatprep.mubr.bf16.mxu1 %v4113_v3 }
 0x304   : > { %2741 = vmatmul.mubr.bf16.gmra.mrb[76].mxu1 %v4115_v35 }
 0x305   : > { %2748 = vmatprep.mubr.bf16.mxu1 %v4116_v52 }
 0x30c   : > { %2749 = vmatmul.mubr.bf16.gmra.mrb[80].mxu1 %v4118_v4  ;;  %v2567_v4 = vpop.permute.xlu0 %2566 }
 0x30d   : > { %2756 = vmatprep.mubr.bf16.mxu1 %v4119_v6 }
 0x314   : > { %2757 = vmatmul.mubr.bf16.gmra.mrb[84].mxu1 %v4121_v18 }
 0x315   : > { %2764 = vmatprep.mubr.bf16.mxu1 %v4122_v8 }
 0x31c   : > { %2765 = vmatmul.mubr.bf16.gmra.mrb[88].mxu1 %v4124_v44  ;;  %v2572_v44 = vpop.permute.xlu1 %2571 }
 0x31d   : > { %2772 = vmatprep.mubr.bf16.mxu1 %v4125_v5 }
 0x324   : > { %2773 = vmatmul.mubr.bf16.gmra.mrb[92].mxu1 %v4127_v57 }
 0x325   : > { %3916 = vmatprep.mubr.bf16.mxu1 %v4128_v31 }
 0x3bf   : > { %v3768_v45 = vpop.f32.mrb[64].mxu1 }
 0x3c0   : > { %v3769_v32 = vpop.f32.mrb[65].mxu1 }
 0x3c1   : > { %v3770_v14 = vadd.f32 %v3769_v32, %v3768_v45  ;;  %v3771_v26 = vpop.f32.mrb[66].mxu1 }
 0x3c2   : > { %v3772_v1 = vpop.f32.mrb[67].mxu1 }
 0x3c3   : > { %v2719_v41 = vadd.f32 %v3770_v14, %v2527_v53  ;;  %v3773_v9 = vadd.f32 %v3772_v1, %v3771_v26  ;;  %v2577_v1 = vpop.permute.xlu0 %2576 }
 0x3c5   : > { %v2722_v62 = vadd.f32 %v3773_v9, %v2532_v0  ;;  %v2781_v33 = vmax.f32 %v2719_v41, 0.0 }
 0x3c7   : > { %v2782_v23 = vmax.f32 %v2722_v62, 0.0  ;;  %v3774_v50 = vpop.f32.mrb[68].mxu1  ;;  %v2582_v62 = vpop.permute.xlu1 %2581 }
 0x3c8   : > { %v3775_v40 = vpop.f32.mrb[69].mxu1 }
 0x3c9   : > { %v3776_v27 = vadd.f32 %v3775_v40, %v3774_v50  ;;  %v3777_v56 = vpop.f32.mrb[70].mxu1  ;;  %v2797_v29 = vpack.c.bf16 %v2782_v23, %v2781_v33 }
 0x3ca   : > { %v3778_v36 = vpop.f32.mrb[71].mxu1 }
 0x3cb   : > { %v2727_v15 = vadd.f32 %v3776_v27, %v2537_v20  ;;  %v3779_v37 = vadd.f32 %v3778_v36, %v3777_v56  ;;  %3900 = vmatprep.subr.bf16.mxu1 %v2797_v29  ;;  %v2587_v36 = vpop.permute.xlu0 %2586 }
 0x3cc   : > { %3901 = vmatpush3.bf16.msra.mxu1 %v2797_v29 }
 0x3cd   : > { %v2730_v34 = vadd.f32 %v3779_v37, %v2542_v11  ;;  %v2783_v46 = vmax.f32 %v2727_v15, 0.0 }
 0x3cf   : > { %v2784_v12 = vmax.f32 %v2730_v34, 0.0  ;;  %v3780_v61 = vpop.f32.mrb[72].mxu1  ;;  %v2592_v34 = vpop.permute.xlu1 %2591 }
 0x3d0   : > { %v3781_v2 = vpop.f32.mrb[73].mxu1 }
 0x3d1   : > { %v3782_v59 = vadd.f32 %v3781_v2, %v3780_v61  ;;  %v3783_v39 = vpop.f32.mrb[74].mxu1  ;;  %v2798_v28 = vpack.c.bf16 %v2784_v12, %v2783_v46 }
 0x3d2   : > { %v3784_v54 = vpop.f32.mrb[75].mxu1 }
 0x3d3   : > { %v2735_v25 = vadd.f32 %v3782_v59, %v2547_v22  ;;  %v3785_v51 = vadd.f32 %v3784_v54, %v3783_v39  ;;  %3902 = vmatprep.subr.bf16.mxu1 %v2798_v28  ;;  %v2597_v54 = vpop.permute.xlu0 %2596 }
 0x3d4   : > { %3903 = vmatpush3.bf16.msra.mxu1 %v2798_v28 }
 0x3d5   : > { %v2738_v38 = vadd.f32 %v3785_v51, %v2552_v16  ;;  %v2785_v21 = vmax.f32 %v2735_v25, 0.0 }
 0x3d7   : > { %v2786_v49 = vmax.f32 %v2738_v38, 0.0  ;;  %v3786_v60 = vpop.f32.mrb[76].mxu1  ;;  %v2602_v38 = vpop.permute.xlu1 %2601 }
 0x3d8   : > { %v3787_v10 = vpop.f32.mrb[77].mxu1 }
 0x3d9   : > { %v3788_v63 = vadd.f32 %v3787_v10, %v3786_v60  ;;  %v3789_v48 = vpop.f32.mrb[78].mxu1  ;;  %v2799_v43 = vpack.c.bf16 %v2786_v49, %v2785_v21 }
 0x3da   : > { %v3790_v24 = vpop.f32.mrb[79].mxu1 }
 0x3db   : > { %v2743_v19 = vadd.f32 %v3788_v63, %v2557_v30  ;;  %v3791_v58 = vadd.f32 %v3790_v24, %v3789_v48  ;;  %3904 = vmatprep.subr.bf16.mxu1 %v2799_v43  ;;  %v4129_v63 = vld [vmem:[%s5630_s7 + $0x8] sm:$0xff]   ;;  %v4130_v48 = vld [vmem:[%s5630_s7 + $0x10] sm:$0xff]   ;;  %v4132_v30 = vld [vmem:[%s5630_s7 + $0x20] sm:$0xff]  }
 0x3dc   : > { %3905 = vmatpush3.bf16.msra.mxu1 %v2799_v43  ;;  %v4131_v43 = vld [vmem:[%s5630_s7 + $0x18] sm:$0xff]   ;;  %v4133_v24 = vld [vmem:[%s5630_s7 + $0x28] sm:$0xff]  }
 0x3dd   : > { %v2746_v42 = vadd.f32 %v3791_v58, %v2562_v47  ;;  %v2787_v7 = vmax.f32 %v2743_v19, 0.0  ;;  %v4134_v19 = vld [vmem:[%s5630_s7 + $0x30] sm:$0xff]   ;;  %v4135_v58 = vld [vmem:[%s5630_s7 + $0x38] sm:$0xff]   ;;  %v2840_v47 = vpop.permute.xlu0 %2839 }
 0x3df   : > { %v2788_v55 = vmax.f32 %v2746_v42, 0.0  ;;  %v3792_v13 = vpop.f32.mrb[80].mxu1  ;;  %v2845_v42 = vpop.permute.xlu1 %2844 }
 0x3e0   : > { %v3793_v17 = vpop.f32.mrb[81].mxu1 }
 0x3e1   : > { %v3794_v3 = vadd.f32 %v3793_v17, %v3792_v13  ;;  %v3795_v35 = vpop.f32.mrb[82].mxu1  ;;  %v2800_v52 = vpack.c.bf16 %v2788_v55, %v2787_v7  ;;  %v2850_v7 = vpop.permute.xlu0 %2849 }
 0x3e2   : > { %v3796_v6 = vpop.f32.mrb[83].mxu1 }
 0x3e3   : > { %v2751_v18 = vadd.f32 %v3794_v3, %v2567_v4  ;;  %v3797_v8 = vadd.f32 %v3796_v6, %v3795_v35  ;;  %3906 = vmatprep.subr.bf16.mxu1 %v2800_v52  ;;  %v2855_v55 = vpop.permute.xlu1 %2854 }
 0x3e4   : > { %3907 = vmatpush3.bf16.msra.mxu1 %v2800_v52 }
 0x3e5   : > { %v2754_v5 = vadd.f32 %v3797_v8, %v2572_v44  ;;  %v2789_v57 = vmax.f32 %v2751_v18, 0.0  ;;  %v2860_v13 = vpop.permute.xlu0 %2859 }
 0x3e7   : > { %v2790_v31 = vmax.f32 %v2754_v5, 0.0  ;;  %v3798_v45 = vpop.f32.mrb[84].mxu1  ;;  %v2865_v17 = vpop.permute.xlu1 %2864 }
 0x3e8   : > { %v3799_v32 = vpop.f32.mrb[85].mxu1 }
 0x3e9   : > { %v3800_v14 = vadd.f32 %v3799_v32, %v3798_v45  ;;  %v3801_v26 = vpop.f32.mrb[86].mxu1  ;;  %v2801_v53 = vpack.c.bf16 %v2790_v31, %v2789_v57  ;;  %v3121_v3 = vpop.permute.xlu0 %3120 }
 0x3ea   : > { %v3802_v41 = vpop.f32.mrb[87].mxu1 }
 0x3eb   : > { %v2759_v9 = vadd.f32 %v3800_v14, %v2577_v1  ;;  %v3803_v0 = vadd.f32 %v3802_v41, %v3801_v26  ;;  %3908 = vmatprep.subr.bf16.mxu1 %v2801_v53  ;;  %v3126_v35 = vpop.permute.xlu1 %3125 }
 0x3ec   : > { %3909 = vmatpush3.bf16.msra.mxu1 %v2801_v53 }
 0x3ed   : > { %v2762_v33 = vadd.f32 %v3803_v0, %v2582_v62  ;;  %v2791_v23 = vmax.f32 %v2759_v9, 0.0  ;;  %v2870_v52 = vpop.permute.xlu0 %2869 }
 0x3ef   : > { %v2792_v50 = vmax.f32 %v2762_v33, 0.0  ;;  %v3804_v40 = vpop.f32.mrb[88].mxu1  ;;  %v2875_v4 = vpop.permute.xlu1 %2874 }
 0x3f0   : > { %v3805_v27 = vpop.f32.mrb[89].mxu1 }
 0x3f1   : > { %v3806_v56 = vadd.f32 %v3805_v27, %v3804_v40  ;;  %v3807_v29 = vpop.f32.mrb[90].mxu1  ;;  %v2802_v20 = vpack.c.bf16 %v2792_v50, %v2791_v23  ;;  %v3131_v6 = vpop.permute.xlu0 %3130 }
 0x3f2   : > { %v3808_v15 = vpop.f32.mrb[91].mxu1 }
 0x3f3   : > { %v2767_v37 = vadd.f32 %v3806_v56, %v2587_v36  ;;  %v3809_v11 = vadd.f32 %v3808_v15, %v3807_v29  ;;  %3910 = vmatprep.subr.bf16.mxu1 %v2802_v20  ;;  %v3136_v18 = vpop.permute.xlu1 %3135 }
 0x3f4   : > { %3911 = vmatpush3.bf16.msra.mxu1 %v2802_v20 }
 0x3f5   : > { %v2770_v46 = vadd.f32 %v3809_v11, %v2592_v34  ;;  %v2793_v12 = vmax.f32 %v2767_v37, 0.0  ;;  %v2880_v8 = vpop.permute.xlu0 %2879 }
 0x3f7   : > { %v2794_v61 = vmax.f32 %v2770_v46, 0.0  ;;  %v3810_v2 = vpop.f32.mrb[92].mxu1  ;;  %v2885_v44 = vpop.permute.xlu1 %2884 }
 0x3f8   : > { %v3811_v59 = vpop.f32.mrb[93].mxu1 }
 0x3f9   : > { %v3812_v39 = vadd.f32 %v3811_v59, %v3810_v2  ;;  %v3813_v28 = vpop.f32.mrb[94].mxu1  ;;  %v2803_v22 = vpack.c.bf16 %v2794_v61, %v2793_v12  ;;  %v3141_v5 = vpop.permute.xlu0 %3140 }
 0x3fa   : > { %v3814_v25 = vpop.f32.mrb[95].mxu1 }
 0x3fb   : > { %v2775_v51 = vadd.f32 %v3812_v39, %v2597_v54  ;;  %v3815_v16 = vadd.f32 %v3814_v25, %v3813_v28  ;;  %3912 = vmatprep.subr.bf16.mxu1 %v2803_v22  ;;  %v5570_v57 = vpop.permute.xlu1 %3145 }
 0x3fc   : > { %3913 = vmatpush3.bf16.msra.mxu1 %v2803_v22 }
 0x3fd   : > { %v2778_v21 = vadd.f32 %v3815_v16, %v2602_v38  ;;  %v2795_v49 = vmax.f32 %v2775_v51, 0.0  ;;  %v2890_v31 = vpop.permute.xlu0 %2889 }
 0x3ff   : > { %v2796_v60 = vmax.f32 %v2778_v21, 0.0  ;;  %v2895_v45 = vpop.permute.xlu1 %2894 }
 0x401   : > { %v2804_v10 = vpack.c.bf16 %v2796_v60, %v2795_v49  ;;  %v3151_v0 = vpop.permute.xlu0 %3150 }
 0x403   : > { %3914 = vmatprep.subr.bf16.mxu1 %v2804_v10  ;;  %v3156_v50 = vpop.permute.xlu1 %3155 }
 0x404   : > { %3915 = vmatpush3.bf16.msra.mxu1 %v2804_v10 }
 0x405   : > { %v2900_v37 = vpop.permute.xlu0 %2899 }
 0x407   : > { %3917 = vmatmul.mubr.bf16.vlgmr.msra.gmra.mrb[96].mxu1 %v4129_v63  ;;  %v2905_v39 = vpop.permute.xlu1 %2904 }
 0x408   : > { %3920 = vmatprep.mubr.bf16.mxu1 %v4130_v48 }
 0x409   : > { %v3161_v63 = vpop.permute.xlu0 %3160 }
 0x40f   : > { %3921 = vmatmul.mubr.bf16.gmra.mrb[100].mxu1 %v4131_v43 }
 0x410   : > { %3924 = vmatprep.mubr.bf16.mxu1 %v4132_v30 }
 0x417   : > { %3925 = vmatmul.mubr.bf16.gmra.mrb[104].mxu1 %v4133_v24 }
 0x418   : > { %3928 = vmatprep.mubr.bf16.mxu1 %v4134_v19 }
 0x41f   : > { %3929 = vmatmul.mubr.bf16.gmra.mrb[108].mxu1 %v4135_v58 }
 0x4da   : > { %v3918_v32 = vpop.f32.mrb[96].mxu1 }
 0x4db   : > { %v3008_v14 = vadd.f32 %v3918_v32, %v2850_v7  ;;  %v2999_v26 = vpop.f32.mrb[97].mxu1 }
 0x4dc   : > { %v3000_v53 = vadd.f32 %v2999_v26, %v2840_v47  ;;  %v3919_v1 = vpop.f32.mrb[98].mxu1  ;;  %v3166_v47 = vpop.permute.xlu1 %3165 }
 0x4dd   : > { %v3011_v41 = vadd.f32 %v3919_v1, %v2855_v55  ;;  %v3002_v9 = vpop.f32.mrb[99].mxu1  ;;  %v3064_v33 = vmax.f32 %v3008_v14, 0.0 }
 0x4de   : > { %v3003_v62 = vadd.f32 %v3002_v9, %v2845_v42  ;;  %v3062_v40 = vmax.f32 %v3000_v53, 0.0 }
 0x4df   : > { %v3065_v23 = vmax.f32 %v3011_v41, 0.0 }
 0x4e0   : > { %v3063_v27 = vmax.f32 %v3003_v62, 0.0  ;;  %v2915_v62 = vpop.permute.xlu1 %2914 }
 0x4e1   : > { %v3079_v56 = vpack.c.bf16 %v3065_v23, %v3064_v33 }
 0x4e2   : > { %v3078_v29 = vpack.c.bf16 %v3063_v27, %v3062_v40  ;;  %v3922_v20 = vpop.f32.mrb[100].mxu1 }
 0x4e3   : > { %v3024_v36 = vadd.f32 %v3922_v20, %v2870_v52  ;;  %v3015_v15 = vpop.f32.mrb[101].mxu1  ;;  %v3088_v11 = vunpack.c.l.bf16 %v3079_v56  ;;  %v3089_v28 = vunpack.c.h.bf16 %v3079_v56 }
 0x4e4   : > { %v3086_v34 = vunpack.c.l.bf16 %v3078_v29  ;;  %v3087_v46 = vunpack.c.h.bf16 %v3078_v29  ;;  %v3016_v12 = vadd.f32 %v3015_v15, %v2860_v13  ;;  %v3923_v61 = vpop.f32.mrb[102].mxu1 }
 0x4e5   : > { %v3027_v2 = vadd.f32 %v3923_v61, %v2875_v4  ;;  %v3018_v59 = vpop.f32.mrb[103].mxu1  ;;  %v3068_v51 = vmax.f32 %v3024_v36, 0.0  ;;  %v3200_v38 = vmul.f32 %v3131_v6, %v3088_v11  ;;  %v3201_v48 = vmul.f32 %v3136_v18, %v3089_v28  ;;  %v2910_v18 = vpop.permute.xlu0 %2909 }
 0x4e6   : > { %v3198_v22 = vmul.f32 %v3121_v3, %v3086_v34  ;;  %v3199_v54 = vmul.f32 %v3126_v35, %v3087_v46  ;;  %v3019_v25 = vadd.f32 %v3018_v59, %v2865_v17  ;;  %v3066_v49 = vmax.f32 %v3016_v12, 0.0  ;;  %v3176_v59 = vpop.permute.xlu1 %3175 }
 0x4e7   : > { %v3069_v16 = vmax.f32 %v3027_v2, 0.0 }
 0x4e8   : > { %v3214_v21 = vadd.f32 %v3199_v54, %v3198_v22  ;;  %v3067_v60 = vmax.f32 %v3019_v25, 0.0 }
 0x4e9   : > { %v3081_v10 = vpack.c.bf16 %v3069_v16, %v3068_v51 }
 0x4ea   : > { %v3215_v43 = vadd.f32 %v3214_v21, %v3200_v38  ;;  %v3080_v30 = vpack.c.bf16 %v3067_v60, %v3066_v49  ;;  %v3926_v24 = vpop.f32.mrb[104].mxu1 }
 0x4eb   : > { %v3040_v19 = vadd.f32 %v3926_v24, %v2890_v31  ;;  %v3031_v58 = vpop.f32.mrb[105].mxu1  ;;  %v3092_v52 = vunpack.c.l.bf16 %v3081_v10  ;;  %v3093_v32 = vunpack.c.h.bf16 %v3081_v10 }
 0x4ec   : > { %v3090_v42 = vunpack.c.l.bf16 %v3080_v30  ;;  %v3091_v7 = vunpack.c.h.bf16 %v3080_v30  ;;  %v3216_v55 = vadd.f32 %v3215_v43, %v3201_v48  ;;  %v3032_v13 = vadd.f32 %v3031_v58, %v2880_v8  ;;  %v3927_v17 = vpop.f32.mrb[106].mxu1 }
 0x4ed   : > { %v3043_v3 = vadd.f32 %v3927_v17, %v2895_v45  ;;  %v3034_v35 = vpop.f32.mrb[107].mxu1  ;;  %v3072_v14 = vmax.f32 %v3040_v19, 0.0  ;;  %v3204_v33 = vmul.f32 %v3151_v0, %v3092_v52  ;;  %v3205_v56 = vmul.f32 %v3156_v50, %v3093_v32 }
 0x4ee   : > { %v3202_v4 = vmul.f32 %v3141_v5, %v3090_v42  ;;  %v3035_v6 = vadd.f32 %v3034_v35, %v2885_v44  ;;  %v3203_v53 = vmul.f32 %v5570_v57, %v3091_v7  ;;  %v3070_v31 = vmax.f32 %v3032_v13, 0.0  ;;  %v3171_v57 = vpop.permute.xlu0 %3170 }
 0x4ef   : > { %v3073_v26 = vmax.f32 %v3043_v3, 0.0  ;;  %v3241_v3 = vlaneseq }
 0x4f0   : > { %v3217_v1 = vadd.f32 %v3216_v55, %v3202_v4  ;;  %v3071_v41 = vmax.f32 %v3035_v6, 0.0 }
 0x4f1   : > { %v3083_v9 = vpack.c.bf16 %v3073_v26, %v3072_v14  ;;  %v3242_v4 = vshrl.u32 %v3241_v3, 7 }
 0x4f2   : > { %v3218_v23 = vadd.f32 %v3217_v1, %v3203_v53  ;;  %v3082_v8 = vpack.c.bf16 %v3071_v41, %v3070_v31  ;;  %v3930_v40 = vpop.f32.mrb[108].mxu1 }
 0x4f3   : > { %v3056_v45 = vadd.f32 %v3930_v40, %v2910_v18  ;;  %v3047_v27 = vpop.f32.mrb[109].mxu1  ;;  %v3096_v34 = vunpack.c.l.bf16 %v3083_v9  ;;  %v3097_v28 = vunpack.c.h.bf16 %v3083_v9  ;;  %v3243_v14 = vsub.s32 0, %v3242_v4 }
 0x4f4   : > { %v3219_v5 = vadd.f32 %v3218_v23, %v3204_v33  ;;  %v3094_v44 = vunpack.c.l.bf16 %v3082_v8  ;;  %v3095_v29 = vunpack.c.h.bf16 %v3082_v8  ;;  %v3931_v20 = vpop.f32.mrb[110].mxu1  ;;  %v3048_v36 = vadd.f32 %v3047_v27, %v2900_v37  ;;  %v3181_v37 = vpop.permute.xlu0 %3180 }
 0x4f5   : > { %v3059_v15 = vadd.f32 %v3931_v20, %v2915_v62  ;;  %v3050_v11 = vpop.f32.mrb[111].mxu1  ;;  %v3076_v61 = vmax.f32 %v3056_v45, 0.0  ;;  %v3208_v16 = vmul.f32 %v3171_v57, %v3096_v34  ;;  %v3209_v49 = vmul.f32 %v3176_v59, %v3097_v28 }
 0x4f6   : > { %v3206_v46 = vmul.f32 %v3161_v63, %v3094_v44  ;;  %v3220_v12 = vadd.f32 %v3219_v5, %v3205_v56  ;;  %v3051_v0 = vadd.f32 %v3050_v11, %v2905_v39  ;;  %v3207_v22 = vmul.f32 %v3166_v47, %v3095_v29  ;;  %v3186_v63 = vpop.permute.xlu1 %3185 }
 0x4f7   : > { %v3077_v2 = vmax.f32 %v3059_v15, 0.0  ;;  %v3074_v25 = vmax.f32 %v3048_v36, 0.0 }
 0x4f8   : > { %v3221_v54 = vadd.f32 %v3220_v12, %v3206_v46  ;;  %v3075_v51 = vmax.f32 %v3051_v0, 0.0  ;;  %v3191_v47 = vpop.permute.xlu0 %3190 }
 0x4f9   : > { %v3085_v50 = vpack.c.bf16 %v3077_v2, %v3076_v61 }
 0x4fa   : > { %v3222_v38 = vadd.f32 %v3221_v54, %v3207_v22  ;;  %v3084_v21 = vpack.c.bf16 %v3075_v51, %v3074_v25  ;;  %v3196_v55 = vpop.permute.xlu1 %3195 }
 0x4fb   : > { %v3100_v30 = vunpack.c.l.bf16 %v3085_v50  ;;  %v3101_v39 = vunpack.c.h.bf16 %v3085_v50 }
 0x4fc   : > { %v3223_v60 = vadd.f32 %v3222_v38, %v3208_v16  ;;  %v3098_v10 = vunpack.c.l.bf16 %v3084_v21  ;;  %v3099_v48 = vunpack.c.h.bf16 %v3084_v21  ;;  %v3239_v18 = vpop.permute.xlu0 %3238 }
 0x4fd   : > { %v3212_v42 = vmul.f32 %v3191_v47, %v3100_v30  ;;  %v3213_v13 = vmul.f32 %v3196_v55, %v3101_v39  ;;  %v3244_v1 = vrot.slane %v3239_v18, %v3243_v14 }
 0x4fe   : > { %v3224_v43 = vadd.f32 %v3223_v60, %v3209_v49  ;;  %v3210_v24 = vmul.f32 %v3181_v37, %v3098_v10  ;;  %v3211_v19 = vmul.f32 %v3186_v63, %v3099_v48 }
 0x500   : > { %v3225_v58 = vadd.f32 %v3224_v43, %v3210_v24 }
 0x502   : > { %v3226_v7 = vadd.f32 %v3225_v58, %v3211_v19 }
 0x504   : > { %v3227_v17 = vadd.f32 %v3226_v7, %v3212_v42 }
 0x506   : > { %v3228_v35 = vadd.f32 %v3227_v17, %v3213_v13 }
 0x508   : > { %v3229_v52 = vrot.slane %v3228_v35, 4 }
 0x50a   : > { %v3230_v6 = vadd.f32 %v3229_v52, %v3228_v35 }
 0x50c   : > { %v3231_v32 = vrot.slane %v3230_v6, 2 }
 0x50e   : > { %v3232_v26 = vadd.f32 %v3231_v32, %v3230_v6 }
 0x510   : > { %v3233_v53 = vrot.slane %v3232_v26, 1 }
 0x512   : > { %v3234_v31 = vadd.f32 %v3233_v53, %v3232_v26 }
 0x514   : > { %v3245_v41 = vadd.f32 %v3244_v1, %v3234_v31 }
 0x516   : > { %v3246_v9 = vand.u32 2147483647, %v3245_v41  ;;  %vm3250_vm1 = vcmp.ge.f32.partialorder %v3245_v41, 0.0 }
 0x518   : > { %v3247_v62 = vsub.f32 0.0, %v3246_v9 }
 0x51a   : > { %v3248_v33 = vmul.f32 1.442695, %v3247_v62 }
 0x51c   : > { %4136 = vpow2.f32 %v3248_v33 }
 0x526   : > { %v4137_v23 = vpop.eup %4136 }
 0x527   : > { %v3252_v8 = vadd.f32 1.0, %v4137_v23  ;;  %v3251_v45 = vsel %vm3250_vm1, 1.0, %v4137_v23 }
 0x529   : > { %4138 = vrcp.f32 %v3252_v8 }
 0x533   : > { %v4139_v40 = vpop.eup %4138 }
 0x534   : > { %v3254_v27 = vmul.f32 %v4139_v40, %v3251_v45 }
 0x536   : > { %3255 = vst [vmem:[%s438_s23] sm:$0x1] %v3254_v27 }
 0x537   : > { %4153 = shalt.err (!%p4150_p5)
}
 0x538   : > { %s4154_s30 = scalar_lea.hbm %s5579_s13, 16  ;;  %s4158_s26 = scalar_lea.hbm %s5634_s11, 32 }
 0x539   : > { %p4155_p7 = scmp.ne.s32.totalorder %s5579_s13, %s4154_s30  ;;  %p4159_p12 = scmp.lt.u32.totalorder %s5579_s13, %s5634_s11 }
 0x53a   : > { %p4160_p13 = scmp.lt.u32.totalorder %s4158_s26, %s4154_s30  ;;  %p4162_p1 = scmp.lt.u32.totalorder %s4154_s30, %s5579_s13 }
 0x53b   : > { %p4156_p10 = pnand %p4155_p7, %p4307_p6 }
 0x53c   : > { %p4161_p0 = por %p4160_p13, %p4159_p12 }
 0x53d   : > { %p4157_p11 = pneg %p4156_p10 }
 0x53e   : > { %p4163_p2 = por %p4162_p1, %p4161_p0 }
 0x540   : > { %p4164_p3 = pnand %p4163_p2, %p4157_p11 }
 0x542   : > { %4167 = shalt.err (!%p4164_p3)
}
 0x543   : > { %3932 = dma.vmem_to_hbm [thread:$0]  (%p4307_p6), %s5581_s25, 16, %s5579_s13, %s3257_s14  }
 0x544 PF: > { %s3281_s15 = sand.u32 1, %s4190_s19   ;;  %p3935_p4 = pnand %p3332_p9, %p4311_p8 }
 0x545   : > { %s3282_s16 = scalar_lea.sflag [#allocation5], %s3281_s15 }
 0x546   : > { %4185 = dma.done.wait (!%p3935_p4), %s3282_s16, 16  }
 0x547   : > { %4187 = vsyncadd (!%p3935_p4), %s3282_s16, 4294967280  ;;  %p23_p5 = scmp.ge.s32.totalorder %s4292_s24, 4   ;;  %s5645_s19 = smov %s4194_s20 }
 0x548   : > { %s5646_s20 = smov %s4198_s21  ;;  %s5647_s21 = smov %s4305_s27 }
 0x549   : > { %s5648_s22 = smov %s4292_s24  ;;  %25 = sbr.rel (!%p23_p5) target bundleno = 6 (0x6), region = 145 }
 0x550   :  { %3286 = vsyncpa [#allocation5], 1 }
 0x551   :  { %3288 = vsyncpa [#allocation5 + $0x1], 1 }

</bundles_post_ra>
